<compile_context>
chip_gen: v5e
topology: v5e:2x2
jax: 0.10.0
libtpu: 0.0.40
codegen_flags: <defaults>
</compile_context>

<pallas_src>
import jax
import jax.numpy as jnp
from jax.experimental import pallas as pl
from jax.experimental.pallas import tpu as pltpu

# ----- small shapes consistent with the module -----
N = 2            # batch
C_IN = 4         # in_channels
C_OUT = 4        # out_channels (== C_IN -> identity residual)
T = 8            # temporal length
V = 16           # graph vertices
TV = T * V       # 128 -> exactly one lane tile
C_AUG = 8        # in-channels + bias-ones channel, zero-padded to a sublane multiple
K_SP = 3         # kernel_size[1]  (spatial / adjacency kernel)
KT = 3           # kernel_size[0]  (temporal kernel, odd)
PAD = (KT - 1) // 2
BN_EPS = 1e-5

_PREC = jax.lax.Precision.HIGHEST


# ------------------------------ fused kernel ---------------------------------
def gcb_kernel(xa_ref, abd_ref, wc_ref, wt_ref, sh_ref, t1_ref, t2_ref, out_ref):
    """One batch item per grid step; all values are (rows, 128) lane-dense."""
    xa = xa_ref[...]                                    # (C_AUG, TV)

    # gcn: 1x1 conv (bias + BN1 scale pre-folded into wc) followed by the
    # adjacency contraction, fused over time via block-diagonal A matrices.
    g = jnp.zeros((C_OUT, TV), jnp.float32)
    for k in range(K_SP):                               # static, unrolled
        yk = jnp.dot(wc_ref[k], xa, precision=_PREC,
                     preferred_element_type=jnp.float32)        # (C_OUT, TV)
        g = g + jnp.dot(yk, abd_ref[k], precision=_PREC,
                        preferred_element_type=jnp.float32)     # (C_OUT, TV)

    # tcn: BN1 shift (scale already folded) + ReLU
    h = jnp.maximum(g + t1_ref[...], 0.0)

    # temporal (KT x 1) conv with zero padding, expressed as constant lane-shift
    # matrices (MXU) -> no VMEM scratch, no misaligned lane slices.
    tconv = jnp.zeros((C_OUT, TV), jnp.float32)
    for dt in range(KT):                                # static, unrolled
        hs = jnp.dot(h, sh_ref[dt], precision=_PREC,
                     preferred_element_type=jnp.float32)        # shifted window
        tconv = tconv + jnp.dot(wt_ref[dt], hs, precision=_PREC,
                                preferred_element_type=jnp.float32)

    # BN2 shift (temporal-conv bias folded) + identity residual + ReLU
    res = xa[:C_IN]                                     # original x channels
    out_ref[...] = jnp.maximum(tconv + t2_ref[...] + res, 0.0)


# ------------------------------ wrapper ---------------------------------------
def graph_conv_block_forward(x, A, params):
    (wc, bc, g1, b1, m1, v1, wt, bt, g2, b2, m2, v2) = params
    n, c_in, t, v = x.shape
    assert (c_in, t, v) == (C_IN, T, V) and c_in == C_OUT

    # BatchNorm (eval) folded to per-channel affine; conv biases folded too.
    s1 = g1 / jnp.sqrt(v1 + BN_EPS)
    t1 = b1 - m1 * s1
    s2 = g2 / jnp.sqrt(v2 + BN_EPS)
    t2 = s2 * bt + (b2 - m2 * s2)

    # lane-dense input (N, C_AUG, TV): x channels, a ones channel carrying the
    # gcn conv bias, zero channels padding to 8 rows.
    xa = jnp.concatenate(
        [x.reshape(n, C_IN, TV),
         jnp.ones((n, 1, TV), x.dtype),
         jnp.zeros((n, C_AUG - C_IN - 1, TV), x.dtype)], axis=1)

    # gcn 1x1 weight (K*C_OUT, C_IN, 1, 1) + bias -> (K_SP, C_OUT, C_AUG),
    # with BN1 scale folded in (row (k,c) scaled by s1[c]).
    wc_aug = jnp.concatenate([wc[:, :, 0, 0], bc[:, None]], axis=1)   # (K*C_OUT, C_IN+1)
    wc_aug = wc_aug * jnp.tile(s1, K_SP)[:, None]
    wc_aug = jnp.pad(wc_aug, ((0, 0), (0, C_AUG - C_IN - 1)))
    wc_k = wc_aug.reshape(K_SP, C_OUT, C_AUG)

    # temporal conv weight (C_OUT, C_OUT, KT, 1) -> (KT, co, ci), BN2 scale folded.
    wt_k = jnp.transpose(wt[:, :, :, 0], (2, 0, 1)) * s2[None, :, None]

    # block-diagonal adjacency: Abd[n,k][(t,v),(u,w)] = delta(t,u) * A[n,k,v,w]
    eyeT = jnp.eye(T, dtype=jnp.float32)
    abd = jnp.einsum('tu,nkvw->nktvuw', eyeT, A).reshape(n, K_SP, TV, TV)

    # temporal lane-shift matrices (with zero padding baked in):
    # S[dt][(t,v),(u,w)] = delta(v,w) * [t == u + dt - PAD]
    eyeV = jnp.eye(V, dtype=jnp.float32)
    sh = jnp.stack(
        [jnp.kron(jnp.eye(T, T, k=PAD - dt, dtype=jnp.float32), eyeV)
         for dt in range(KT)], axis=0)                                # (KT, TV, TV)

    t1b = jnp.broadcast_to(t1[:, None], (C_OUT, TV)).astype(jnp.float32)
    t2b = jnp.broadcast_to(t2[:, None], (C_OUT, TV)).astype(jnp.float32)

    out = pl.pallas_call(
        gcb_kernel,
        out_shape=jax.ShapeDtypeStruct((n, C_OUT, TV), jnp.float32),
        grid=(n,),
        in_specs=[
            pl.BlockSpec((None, C_AUG, TV), lambda i: (i, 0, 0)),        # xa
            pl.BlockSpec((None, K_SP, TV, TV), lambda i: (i, 0, 0, 0)),  # block-diag A
            pl.BlockSpec((K_SP, C_OUT, C_AUG), lambda i: (0, 0, 0)),     # gcn weight
            pl.BlockSpec((KT, C_OUT, C_OUT), lambda i: (0, 0, 0)),       # tcn weight
            pl.BlockSpec((KT, TV, TV), lambda i: (0, 0, 0)),             # shift mats
            pl.BlockSpec((C_OUT, TV), lambda i: (0, 0)),                 # BN1 shift
            pl.BlockSpec((C_OUT, TV), lambda i: (0, 0)),                 # BN2 shift
        ],
        out_specs=pl.BlockSpec((None, C_OUT, TV), lambda i: (i, 0, 0)),
        compiler_params=pltpu.CompilerParams(
            dimension_semantics=("parallel",)),
    )(xa, abd, wc_k, wt_k, sh, t1b, t2b)

    return out.reshape(n, C_OUT, T, V)


# ------------------------- pure-JAX reference ----------------------------------
def reference_forward(x, A, params):
    (wc, bc, g1, b1, m1, v1, wt, bt, g2, b2, m2, v2) = params
    n, c_in, t, v = x.shape
    c_out = wc.shape[0] // K_SP

    # gcn: 1x1 conv + adjacency einsum
    y = jnp.einsum('oc,nctv->notv', wc[:, :, 0, 0], x, precision=_PREC)
    y = y + bc[None, :, None, None]
    y = y.reshape(n, K_SP, c_out, t, v)
    g = jnp.einsum('nkctv,nkvw->nctw', y, A, precision=_PREC)

    # tcn: BN1 -> ReLU -> conv(KT,1) -> BN2 (Dropout = identity in eval)
    s1 = g1 / jnp.sqrt(v1 + BN_EPS)
    t1 = b1 - m1 * s1
    h = jnp.maximum(s1[None, :, None, None] * g + t1[None, :, None, None], 0.0)
    hp = jnp.pad(h, ((0, 0), (0, 0), (PAD, PAD), (0, 0)))
    tc = jnp.broadcast_to(bt[None, :, None, None], g.shape)
    for j in range(KT):
        tc = tc + jnp.einsum('oi,nitv->notv', wt[:, :, j, 0],
                             hp[:, :, j:j + t, :], precision=_PREC)
    s2 = g2 / jnp.sqrt(v2 + BN_EPS)
    t2 = b2 - m2 * s2
    o = s2[None, :, None, None] * tc + t2[None, :, None, None]

    return jnp.maximum(o + x, 0.0)     # identity residual + relu


# --------------------------------- main -----------------------------------------
if __name__ == "__main__":
    key = jax.random.PRNGKey(0)
    ks = jax.random.split(key, 14)

    x = jax.random.normal(ks[0], (N, C_IN, T, V), jnp.float32)
    a_raw = jax.random.uniform(ks[1], (N, K_SP, V, V), jnp.float32)
    A = a_raw / jnp.sum(a_raw, axis=-1, keepdims=True)      # row-normalized adjacency

    wc = 0.3 * jax.random.normal(ks[2], (K_SP * C_OUT, C_IN, 1, 1), jnp.float32)
    bc = 0.1 * jax.random.normal(ks[3], (K_SP * C_OUT,), jnp.float32)
    g1 = 1.0 + 0.1 * jax.random.normal(ks[4], (C_OUT,), jnp.float32)
    b1 = 0.1 * jax.random.normal(ks[5], (C_OUT,), jnp.float32)
    m1 = 0.1 * jax.random.normal(ks[6], (C_OUT,), jnp.float32)
    v1 = jax.random.uniform(ks[7], (C_OUT,), jnp.float32, 0.5, 1.5)
    wt = 0.3 * jax.random.normal(ks[8], (C_OUT, C_OUT, KT, 1), jnp.float32)
    bt = 0.1 * jax.random.normal(ks[9], (C_OUT,), jnp.float32)
    g2 = 1.0 + 0.1 * jax.random.normal(ks[10], (C_OUT,), jnp.float32)
    b2 = 0.1 * jax.random.normal(ks[11], (C_OUT,), jnp.float32)
    m2 = 0.1 * jax.random.normal(ks[12], (C_OUT,), jnp.float32)
    v2 = jax.random.uniform(ks[13], (C_OUT,), jnp.float32, 0.5, 1.5)

    params = (wc, bc, g1, b1, m1, v1, wt, bt, g2, b2, m2, v2)

    out = graph_conv_block_forward(x, A, params)
    jax.block_until_ready(out)

    ref = reference_forward(x, A, params)

    assert out.shape == (N, C_OUT, T, V)
    err = float(jnp.max(jnp.abs(out - ref)))
    assert jnp.allclose(out, ref, atol=1e-4, rtol=1e-4), err

    print("KERNEL_OK")
</pallas_src>

<mosaic_0001>
module attributes {stable_mosaic.version = 11 : i64} {
  func.func @gcb_kernel(%arg0: i32, %arg1: memref<1x8x128xf32, #tpu.memory_space<vmem>>, %arg2: memref<1x3x128x128xf32, #tpu.memory_space<vmem>>, %arg3: memref<3x4x8xf32, #tpu.memory_space<vmem>>, %arg4: memref<3x4x4xf32, #tpu.memory_space<vmem>>, %arg5: memref<3x128x128xf32, #tpu.memory_space<vmem>>, %arg6: memref<4x128xf32, #tpu.memory_space<vmem>>, %arg7: memref<4x128xf32, #tpu.memory_space<vmem>>, %arg8: memref<1x4x128xf32, #tpu.memory_space<vmem>>) attributes {dimension_semantics = [#tpu.dimension_semantics<parallel>], iteration_bounds = array<i64: 2>, scalar_prefetch = 0 : i64, scratch_operands = 0 : i64, tpu.core_type = #tpu.core_type<tc>, window_params = [{transform_indices = @transform_0, window_bounds = array<i64: 1, 8, 128>}, {transform_indices = @transform_1, window_bounds = array<i64: 1, 3, 128, 128>}, {pipeline_mode = #tpu.pipeline_mode<synchronous>, transform_indices = @transform_2, window_bounds = array<i64: 3, 4, 8>}, {pipeline_mode = #tpu.pipeline_mode<synchronous>, transform_indices = @transform_3, window_bounds = array<i64: 3, 4, 4>}, {pipeline_mode = #tpu.pipeline_mode<synchronous>, transform_indices = @transform_4, window_bounds = array<i64: 3, 128, 128>}, {pipeline_mode = #tpu.pipeline_mode<synchronous>, transform_indices = @transform_5, window_bounds = array<i64: 4, 128>}, {pipeline_mode = #tpu.pipeline_mode<synchronous>, transform_indices = @transform_6, window_bounds = array<i64: 4, 128>}, {transform_indices = @transform_7, window_bounds = array<i64: 1, 4, 128>}]} {
    %c0 = arith.constant 0 : index
    %c0_0 = arith.constant 0 : index
    %c0_1 = arith.constant 0 : index
    %0 = vector.load %arg1[%c0, %c0_0, %c0_1] : memref<1x8x128xf32, #tpu.memory_space<vmem>>, vector<1x8x128xf32>
    %1 = vector.shape_cast %0 : vector<1x8x128xf32> to vector<8x128xf32>
    %cst = arith.constant 0.000000e+00 : f32
    %2 = vector.broadcast %cst : f32 to vector<4x128xf32>
    %c0_2 = arith.constant 0 : index
    %c0_3 = arith.constant 0 : index
    %c0_4 = arith.constant 0 : index
    %3 = vector.load %arg3[%c0_2, %c0_3, %c0_4] : memref<3x4x8xf32, #tpu.memory_space<vmem>>, vector<1x4x8xf32>
    %4 = vector.shape_cast %3 : vector<1x4x8xf32> to vector<4x8xf32>
    %cst_5 = arith.constant dense<0.000000e+00> : vector<4x128xf32>
    %5 = tpu.matmul %4, %1, %cst_5 {dimension_numbers = #tpu.dot_dimension_numbers<[1], [0], [0], [1], [0, 0, 1, 1], [], []>, precision = #tpu.contract_precision<fp32>} : vector<4x8xf32>, vector<8x128xf32>, vector<4x128xf32> -> vector<4x128xf32>
    %c0_6 = arith.constant 0 : index
    %c0_7 = arith.constant 0 : index
    %c0_8 = arith.constant 0 : index
    %c0_9 = arith.constant 0 : index
    %6 = vector.load %arg2[%c0_6, %c0_7, %c0_8, %c0_9] : memref<1x3x128x128xf32, #tpu.memory_space<vmem>>, vector<1x1x128x128xf32>
    %7 = vector.shape_cast %6 : vector<1x1x128x128xf32> to vector<128x128xf32>
    %cst_10 = arith.constant dense<0.000000e+00> : vector<4x128xf32>
    %8 = tpu.matmul %5, %7, %cst_10 {dimension_numbers = #tpu.dot_dimension_numbers<[1], [0], [0], [1], [0, 0, 1, 1], [], []>, precision = #tpu.contract_precision<fp32>} : vector<4x128xf32>, vector<128x128xf32>, vector<4x128xf32> -> vector<4x128xf32>
    %9 = arith.addf %2, %8 : vector<4x128xf32>
    %c1 = arith.constant 1 : index
    %c0_11 = arith.constant 0 : index
    %c0_12 = arith.constant 0 : index
    %10 = vector.load %arg3[%c1, %c0_11, %c0_12] : memref<3x4x8xf32, #tpu.memory_space<vmem>>, vector<1x4x8xf32>
    %11 = vector.shape_cast %10 : vector<1x4x8xf32> to vector<4x8xf32>
    %cst_13 = arith.constant dense<0.000000e+00> : vector<4x128xf32>
    %12 = tpu.matmul %11, %1, %cst_13 {dimension_numbers = #tpu.dot_dimension_numbers<[1], [0], [0], [1], [0, 0, 1, 1], [], []>, precision = #tpu.contract_precision<fp32>} : vector<4x8xf32>, vector<8x128xf32>, vector<4x128xf32> -> vector<4x128xf32>
    %c0_14 = arith.constant 0 : index
    %c1_15 = arith.constant 1 : index
    %c0_16 = arith.constant 0 : index
    %c0_17 = arith.constant 0 : index
    %13 = vector.load %arg2[%c0_14, %c1_15, %c0_16, %c0_17] : memref<1x3x128x128xf32, #tpu.memory_space<vmem>>, vector<1x1x128x128xf32>
    %14 = vector.shape_cast %13 : vector<1x1x128x128xf32> to vector<128x128xf32>
    %cst_18 = arith.constant dense<0.000000e+00> : vector<4x128xf32>
    %15 = tpu.matmul %12, %14, %cst_18 {dimension_numbers = #tpu.dot_dimension_numbers<[1], [0], [0], [1], [0, 0, 1, 1], [], []>, precision = #tpu.contract_precision<fp32>} : vector<4x128xf32>, vector<128x128xf32>, vector<4x128xf32> -> vector<4x128xf32>
    %16 = arith.addf %9, %15 : vector<4x128xf32>
    %c2 = arith.constant 2 : index
    %c0_19 = arith.constant 0 : index
    %c0_20 = arith.constant 0 : index
    %17 = vector.load %arg3[%c2, %c0_19, %c0_20] : memref<3x4x8xf32, #tpu.memory_space<vmem>>, vector<1x4x8xf32>
    %18 = vector.shape_cast %17 : vector<1x4x8xf32> to vector<4x8xf32>
    %cst_21 = arith.constant dense<0.000000e+00> : vector<4x128xf32>
    %19 = tpu.matmul %18, %1, %cst_21 {dimension_numbers = #tpu.dot_dimension_numbers<[1], [0], [0], [1], [0, 0, 1, 1], [], []>, precision = #tpu.contract_precision<fp32>} : vector<4x8xf32>, vector<8x128xf32>, vector<4x128xf32> -> vector<4x128xf32>
    %c0_22 = arith.constant 0 : index
    %c2_23 = arith.constant 2 : index
    %c0_24 = arith.constant 0 : index
    %c0_25 = arith.constant 0 : index
    %20 = vector.load %arg2[%c0_22, %c2_23, %c0_24, %c0_25] : memref<1x3x128x128xf32, #tpu.memory_space<vmem>>, vector<1x1x128x128xf32>
    %21 = vector.shape_cast %20 : vector<1x1x128x128xf32> to vector<128x128xf32>
    %cst_26 = arith.constant dense<0.000000e+00> : vector<4x128xf32>
    %22 = tpu.matmul %19, %21, %cst_26 {dimension_numbers = #tpu.dot_dimension_numbers<[1], [0], [0], [1], [0, 0, 1, 1], [], []>, precision = #tpu.contract_precision<fp32>} : vector<4x128xf32>, vector<128x128xf32>, vector<4x128xf32> -> vector<4x128xf32>
    %23 = arith.addf %16, %22 : vector<4x128xf32>
    %c0_27 = arith.constant 0 : index
    %c0_28 = arith.constant 0 : index
    %24 = vector.load %arg6[%c0_27, %c0_28] : memref<4x128xf32, #tpu.memory_space<vmem>>, vector<4x128xf32>
    %25 = arith.addf %23, %24 : vector<4x128xf32>
    %cst_29 = arith.constant 0.000000e+00 : f32
    %26 = vector.broadcast %cst_29 : f32 to vector<4x128xf32>
    %27 = arith.maximumf %25, %26 : vector<4x128xf32>
    %cst_30 = arith.constant 0.000000e+00 : f32
    %28 = vector.broadcast %cst_30 : f32 to vector<4x128xf32>
    %c0_31 = arith.constant 0 : index
    %c0_32 = arith.constant 0 : index
    %c0_33 = arith.constant 0 : index
    %29 = vector.load %arg5[%c0_31, %c0_32, %c0_33] : memref<3x128x128xf32, #tpu.memory_space<vmem>>, vector<1x128x128xf32>
    %30 = vector.shape_cast %29 : vector<1x128x128xf32> to vector<128x128xf32>
    %cst_34 = arith.constant dense<0.000000e+00> : vector<4x128xf32>
    %31 = tpu.matmul %27, %30, %cst_34 {dimension_numbers = #tpu.dot_dimension_numbers<[1], [0], [0], [1], [0, 0, 1, 1], [], []>, precision = #tpu.contract_precision<fp32>} : vector<4x128xf32>, vector<128x128xf32>, vector<4x128xf32> -> vector<4x128xf32>
    %c0_35 = arith.constant 0 : index
    %c0_36 = arith.constant 0 : index
    %c0_37 = arith.constant 0 : index
    %32 = vector.load %arg4[%c0_35, %c0_36, %c0_37] : memref<3x4x4xf32, #tpu.memory_space<vmem>>, vector<1x4x4xf32>
    %33 = vector.shape_cast %32 : vector<1x4x4xf32> to vector<4x4xf32>
    %cst_38 = arith.constant dense<0.000000e+00> : vector<4x128xf32>
    %34 = tpu.matmul %33, %31, %cst_38 {dimension_numbers = #tpu.dot_dimension_numbers<[1], [0], [0], [1], [0, 0, 1, 1], [], []>, precision = #tpu.contract_precision<fp32>} : vector<4x4xf32>, vector<4x128xf32>, vector<4x128xf32> -> vector<4x128xf32>
    %35 = arith.addf %28, %34 : vector<4x128xf32>
    %c1_39 = arith.constant 1 : index
    %c0_40 = arith.constant 0 : index
    %c0_41 = arith.constant 0 : index
    %36 = vector.load %arg5[%c1_39, %c0_40, %c0_41] : memref<3x128x128xf32, #tpu.memory_space<vmem>>, vector<1x128x128xf32>
    %37 = vector.shape_cast %36 : vector<1x128x128xf32> to vector<128x128xf32>
    %cst_42 = arith.constant dense<0.000000e+00> : vector<4x128xf32>
    %38 = tpu.matmul %27, %37, %cst_42 {dimension_numbers = #tpu.dot_dimension_numbers<[1], [0], [0], [1], [0, 0, 1, 1], [], []>, precision = #tpu.contract_precision<fp32>} : vector<4x128xf32>, vector<128x128xf32>, vector<4x128xf32> -> vector<4x128xf32>
    %c1_43 = arith.constant 1 : index
    %c0_44 = arith.constant 0 : index
    %c0_45 = arith.constant 0 : index
    %39 = vector.load %arg4[%c1_43, %c0_44, %c0_45] : memref<3x4x4xf32, #tpu.memory_space<vmem>>, vector<1x4x4xf32>
    %40 = vector.shape_cast %39 : vector<1x4x4xf32> to vector<4x4xf32>
    %cst_46 = arith.constant dense<0.000000e+00> : vector<4x128xf32>
    %41 = tpu.matmul %40, %38, %cst_46 {dimension_numbers = #tpu.dot_dimension_numbers<[1], [0], [0], [1], [0, 0, 1, 1], [], []>, precision = #tpu.contract_precision<fp32>} : vector<4x4xf32>, vector<4x128xf32>, vector<4x128xf32> -> vector<4x128xf32>
    %42 = arith.addf %35, %41 : vector<4x128xf32>
    %c2_47 = arith.constant 2 : index
    %c0_48 = arith.constant 0 : index
    %c0_49 = arith.constant 0 : index
    %43 = vector.load %arg5[%c2_47, %c0_48, %c0_49] : memref<3x128x128xf32, #tpu.memory_space<vmem>>, vector<1x128x128xf32>
    %44 = vector.shape_cast %43 : vector<1x128x128xf32> to vector<128x128xf32>
    %cst_50 = arith.constant dense<0.000000e+00> : vector<4x128xf32>
    %45 = tpu.matmul %27, %44, %cst_50 {dimension_numbers = #tpu.dot_dimension_numbers<[1], [0], [0], [1], [0, 0, 1, 1], [], []>, precision = #tpu.contract_precision<fp32>} : vector<4x128xf32>, vector<128x128xf32>, vector<4x128xf32> -> vector<4x128xf32>
    %c2_51 = arith.constant 2 : index
    %c0_52 = arith.constant 0 : index
    %c0_53 = arith.constant 0 : index
    %46 = vector.load %arg4[%c2_51, %c0_52, %c0_53] : memref<3x4x4xf32, #tpu.memory_space<vmem>>, vector<1x4x4xf32>
    %47 = vector.shape_cast %46 : vector<1x4x4xf32> to vector<4x4xf32>
    %cst_54 = arith.constant dense<0.000000e+00> : vector<4x128xf32>
    %48 = tpu.matmul %47, %45, %cst_54 {dimension_numbers = #tpu.dot_dimension_numbers<[1], [0], [0], [1], [0, 0, 1, 1], [], []>, precision = #tpu.contract_precision<fp32>} : vector<4x4xf32>, vector<4x128xf32>, vector<4x128xf32> -> vector<4x128xf32>
    %49 = arith.addf %42, %48 : vector<4x128xf32>
    %50 = vector.extract_strided_slice %1 {offsets = [0, 0], sizes = [4, 128], strides = [1, 1]} : vector<8x128xf32> to vector<4x128xf32>
    %c0_55 = arith.constant 0 : index
    %c0_56 = arith.constant 0 : index
    %51 = vector.load %arg7[%c0_55, %c0_56] : memref<4x128xf32, #tpu.memory_space<vmem>>, vector<4x128xf32>
    %52 = arith.addf %49, %51 : vector<4x128xf32>
    %53 = arith.addf %52, %50 : vector<4x128xf32>
    %cst_57 = arith.constant 0.000000e+00 : f32
    %54 = vector.broadcast %cst_57 : f32 to vector<4x128xf32>
    %55 = arith.maximumf %53, %54 : vector<4x128xf32>
    %c0_58 = arith.constant 0 : index
    %c0_59 = arith.constant 0 : index
    %c0_60 = arith.constant 0 : index
    %56 = vector.load %arg8[%c0_58, %c0_59, %c0_60] : memref<1x4x128xf32, #tpu.memory_space<vmem>>, vector<1x4x128xf32>
    %57 = vector.shape_cast %56 : vector<1x4x128xf32> to vector<4x128xf32>
    %58 = vector.shape_cast %55 : vector<4x128xf32> to vector<1x4x128xf32>
    tpu.vector_store %arg8[%c0_58, %c0_59, %c0_60], %58 {strides = array<i32>} : memref<1x4x128xf32, #tpu.memory_space<vmem>>, vector<1x4x128xf32>,
    return
  }
  func.func @transform_0(%arg0: i32) -> (i32, i32, i32) {
    %c0_i32 = arith.constant 0 : i32
    %c0_i32_0 = arith.constant 0 : i32
    %c0_i32_1 = arith.constant 0 : i32
    return %arg0, %c0_i32, %c0_i32_0 : i32, i32, i32
  }
  func.func @transform_1(%arg0: i32) -> (i32, i32, i32, i32) {
    %c0_i32 = arith.constant 0 : i32
    %c0_i32_0 = arith.constant 0 : i32
    %c0_i32_1 = arith.constant 0 : i32
    %c0_i32_2 = arith.constant 0 : i32
    return %arg0, %c0_i32, %c0_i32_0, %c0_i32_1 : i32, i32, i32, i32
  }
  func.func @transform_2(%arg0: i32) -> (i32, i32, i32) {
    %c0_i32 = arith.constant 0 : i32
    %c0_i32_0 = arith.constant 0 : i32
    %c0_i32_1 = arith.constant 0 : i32
    %c0_i32_2 = arith.constant 0 : i32
    return %c0_i32, %c0_i32_0, %c0_i32_1 : i32, i32, i32
  }
  func.func @transform_3(%arg0: i32) -> (i32, i32, i32) {
    %c0_i32 = arith.constant 0 : i32
    %c0_i32_0 = arith.constant 0 : i32
    %c0_i32_1 = arith.constant 0 : i32
    %c0_i32_2 = arith.constant 0 : i32
    return %c0_i32, %c0_i32_0, %c0_i32_1 : i32, i32, i32
  }
  func.func @transform_4(%arg0: i32) -> (i32, i32, i32) {
    %c0_i32 = arith.constant 0 : i32
    %c0_i32_0 = arith.constant 0 : i32
    %c0_i32_1 = arith.constant 0 : i32
    %c0_i32_2 = arith.constant 0 : i32
    return %c0_i32, %c0_i32_0, %c0_i32_1 : i32, i32, i32
  }
  func.func @transform_5(%arg0: i32) -> (i32, i32) {
    %c0_i32 = arith.constant 0 : i32
    %c0_i32_0 = arith.constant 0 : i32
    %c0_i32_1 = arith.constant 0 : i32
    return %c0_i32, %c0_i32_0 : i32, i32
  }
  func.func @transform_6(%arg0: i32) -> (i32, i32) {
    %c0_i32 = arith.constant 0 : i32
    %c0_i32_0 = arith.constant 0 : i32
    %c0_i32_1 = arith.constant 0 : i32
    return %c0_i32, %c0_i32_0 : i32, i32
  }
  func.func @transform_7(%arg0: i32) -> (i32, i32, i32) {
    %c0_i32 = arith.constant 0 : i32
    %c0_i32_0 = arith.constant 0 : i32
    %c0_i32_1 = arith.constant 0 : i32
    return %arg0, %c0_i32, %c0_i32_0 : i32, i32, i32
  }
}

</mosaic_0001>

<bundles_post_ra>
// kernel: tpu_custom_call.1
= control target key start
LH: loop header
LB: loop body
LE: loop exit
PB: predicated region body
PF: predicated region fallthrough
CT: control target
= control target key end

     0   :  { %s5934_s0 = inlined_call_operand.hbm [shape: f32[2,8,128], index: 0, kind: input, shape index: {}]   ;;  %s5935_s1 = inlined_call_operand.hbm [shape: f32[2,3,128,128], index: 1, kind: input, shape index: {}]   ;;  %s5936_s2 = inlined_call_operand.hbm [shape: f32[3,4,8], index: 2, kind: input, shape index: {}]   ;;  %s5937_s3 = inlined_call_operand.hbm [shape: f32[3,4,4], index: 3, kind: input, shape index: {}]   ;;  %s5938_s4 = inlined_call_operand.hbm [shape: f32[3,128,128], index: 4, kind: input, shape index: {}]   ;;  %s5939_s5 = inlined_call_operand.vmem [shape: f32[4,128], index: 5, kind: input, shape index: {}]   ;;  %s5940_s6 = inlined_call_operand.hbm [shape: f32[4,128], index: 6, kind: input, shape index: {}]   ;;  %s5941_s7 = inlined_call_operand.hbm [shape: f32[2,4,128], index: 7, kind: output, shape index: {}]  }
   0x1   :  { %5966 = sst [smem:[#allocation22_spill]] %s5936_s2 }
   0x2   :  { %5967 = sst [smem:[#allocation23_spill]] %s5937_s3 }
   0x3   :  { %5968 = sst [smem:[#allocation24_spill]] %s5938_s4 }
   0x4   :  { %5969 = sst [smem:[#allocation25_spill]] %s5940_s6 }
   0x5   :  { %12 = vsyncpa [#allocation3], 0 }
   0x6   :  { %14 = vsyncpa [#allocation3 + $0x1], 0 }
   0x7   :  { %15 = vsyncpa [#allocation6], 0 }
   0x8   :  { %17 = vsyncpa [#allocation6 + $0x1], 0 }
   0x9   :  { %18 = vsyncpa [#allocation9], 0 }
   0xa   :  { %19 = vsyncpa [#allocation12], 0 }
   0xb   :  { %20 = vsyncpa [#allocation4], 0 }
   0xc   :  { %22 = vsyncpa [#allocation4 + $0x1], 0  ;;  %s4087_s24 = smov 0   ;;  %s4089_s25 = smov 0  }
   0xd   :  { %s4091_s26 = smov 0   ;;  %s4093_s27 = smov 0  }
   0xe LB: > { %5970 = sst [smem:[#allocation20_spill]] %s4033_s26  ;;  %s4111_s8 = sadd.s32 4294967295, %s4037_s27   ;;  %s4037_s27 = sphi %s4093_s27, %s6011_s27   ;;  %s4033_s26 = sphi %s4091_s26, %s6008_s26   ;;  %s4029_s25 = sphi %s4089_s25, %s6010_s25   ;;  %s4025_s24 = sphi %s4087_s24, %s6009_s24  }
   0xf   : > { %s5971_s2 = sld [smem:[#allocation22_spill]]  ;;  %p3623_p0 = scmp.ge.s32.totalorder %s4037_s27, 1 }
  0x10   : > { %p49_p1 = scmp.eq.s32.totalorder %s4111_s8, 0  ;;  %p216_p2 = scmp.lt.s32.totalorder %s4037_s27, 3 }
  0x11   : > { %s4039_s10 = smov [#allocation7]   ;;  %s5973_s3 = sld [smem:[#allocation23_spill]] }
  0x12   : > { %p4116_p3 = pnand %p3623_p0, %p216_p2  ;;  %s229_s11 = sshll.u32 %s4039_s10, 4  ;;  %s230_s11 = int_to_ptr.vmem [resolvable:$true] %s229_s11 }
  0x13   : > { %s5975_s4 = sld [smem:[#allocation24_spill]]  ;;  %s4040_s19 = smov [#allocation8]  }
  0x14   : > { %p3700_p4 = pneg %p4116_p3  ;;  %s243_s20 = sshll.u32 %s4040_s19, 4  ;;  %s244_s20 = int_to_ptr.vmem [resolvable:$true] %s243_s20 }
  0x15   : > { %s227_s30 = sshll.u32 %s5971_s2, 4  ;;  %s4041_s21 = smov 64   ;;  %s228_s30 = int_to_ptr.hbm [resolvable:$true] %s227_s30 }
  0x16   : > { %p4128_p6 = pnand %p3700_p4, %p49_p1  ;;  %s4042_s22 = smov 4  }
  0x17   : > { %s241_s14 = sshll.u32 %s5973_s3, 4  ;;  %s4043_s23 = smov [#allocation10]   ;;  %s242_s14 = int_to_ptr.hbm [resolvable:$true] %s241_s14 }
  0x18   : > { %3703 = dma.hbm_to_vmem [thread:$0]  (!%p4128_p6), %s228_s30, 192, %s230_s11, [#allocation6], %s4041_s21, %s4041_s21, %s4042_s22  }
  0x19   : > { %s255_s18 = sshll.u32 %s5975_s4, 4  ;;  %s257_s28 = sshll.u32 %s4043_s23, 4  ;;  %s256_s18 = int_to_ptr.hbm [resolvable:$true] %s255_s18  ;;  %s258_s28 = int_to_ptr.vmem [resolvable:$true] %s257_s28 }
  0x1a   : > { %3706 = dma.hbm_to_vmem [thread:$0]  (!%p4128_p6), %s242_s14, 192, %s244_s20, [#allocation9], %s4041_s21, %s4041_s21, %s4042_s22  }
  0x1b   : > { %s5976_s6 = sld [smem:[#allocation25_spill]]  ;;  %s5942_s30 = smov 128  }
  0x1c   : > { %s5943_s11 = smov 8   ;;  %s4046_s13 = smov [#allocation11]  }
  0x1d   : > { %3709 = dma.hbm_to_vmem [thread:$0]  (!%p4128_p6), %s256_s18, 6144, %s258_s28, [#allocation9], %s5942_s30, %s5942_s30, %s5943_s11  }
  0x1e   : > { %s275_s14 = sshll.u32 %s4046_s13, 4  ;;  %s3622_s16 = sadd.s32 4294967294, %s4037_s27   ;;  %s276_s14 = int_to_ptr.vmem [resolvable:$true] %s275_s14 }
  0x1f   : > { %s4151_s17 = sadd.s32 1, %s4037_s27   ;;  %s35_s20 = sadd.s32 1, %s4033_s26 }
  0x20   : > { %s32_s19 = ssub.s32 %s4037_s27, %s4151_s17  ;;  %p42_p8 = scmp.ne.s32.totalorder %s4033_s26, %s4029_s25 }
  0x21   : > { %s273_s12 = sshll.u32 %s5976_s6, 4  ;;  %p33_p7 = scmp.eq.s32.totalorder %s32_s19, 0  ;;  %s274_s12 = int_to_ptr.hbm [resolvable:$true] %s273_s12 }
  0x22   : > { %3712 = dma.hbm_to_vmem [thread:$0]  (!%p4128_p6), %s274_s12, 64, %s276_s14, [#allocation12]  }
  0x23   : > { %p43_p9 = scmp.eq.s32.totalorder %s4037_s27, 0  ;;  %p48_p10 = scmp.ne.s32.totalorder %s4029_s25, %s4025_s24 }
  0x24   : > { %s4162_s18 = scalar_select %p33_p7, %s4033_s26, %s35_s20  }
  0x25   : > { %p4164_p11 = por %p43_p9, %p42_p8  ;;  %p4170_p12 = por %p49_p1, %p48_p10 }
  0x26   : > { %5977 = sst [smem:[#allocation21_spill]] %s4162_s18  ;;  %p203_p13 = scmp.eq.s32.totalorder %s4111_s8, 1 }
  0x27   : > { %p209_p0 = scmp.eq.s32.totalorder %s3622_s16, 1  ;;  %p3728_p2 = scmp.lt.s32.totalorder %s4037_s27, 2 }
  0x28   : > { %s4177_s22 = sand.u32 1, %s4033_s26   ;;  %p4179_p4 = por %p203_p13, %p42_p8 }
  0x29   : > { %p4183_p6 = por %p209_p0, %p48_p10  ;;  %s3629_s29 = sshll.u32 %s4177_s22, 3 }
  0x2a   : > { %s3630_s10 = sshll.u32 %s4037_s27, 3  ;;  %s290_s16 = scalar_lea.vmem [#allocation2], %s3629_s29 }
  0x2b   : > { %s294_s14 = scalar_lea.hbm %s5934_s0, %s3630_s10  ;;  %s298_s19 = sshll.u32 %s290_s16, 4  ;;  %s299_s19 = int_to_ptr.vmem [resolvable:$true] %s298_s19 }
  0x2c   : > { %s296_s20 = sshll.u32 %s294_s14, 4  ;;  %p4194_p7 = pnand %p3728_p2, %p4164_p11  ;;  %s297_s20 = int_to_ptr.hbm [resolvable:$true] %s296_s20 }
  0x2d   : > { %s3675_s11 = smul.u32 384, %s4177_s22  ;;  %s305_s2 = sand.u32 1, %s4037_s27  }
  0x2e   : > { %s287_s3 = scalar_lea.sflag [#allocation3], %s4177_s22  ;;  %s3895_s4 = sshra.s32 %s297_s20, 4  ;;  %s3896_s4 = int_to_ptr.hbm [resolvable:$true] %s3895_s4 }
  0x2f   : > { %s3897_s6 = scalar_lea.hbm %s3896_s4, 8  ;;  %p3899_p9 = pneg %p4194_p7 }
  0x30   : > { %p3898_p8 = scmp.ne.s32.totalorder %s3896_s4, %s3897_s6  ;;  %s3902_s10 = scalar_lea.hbm %s5934_s0, 16 }
  0x31   : > { %p3903_p11 = scmp.lt.s32.totalorder %s3896_s4, %s5934_s0  ;;  %p3904_p0 = scmp.lt.s32.totalorder %s3902_s10, %s3897_s6 }
  0x32   : > { %p3900_p10 = pnand %p3899_p9, %p3898_p8 }
  0x33   : > { %p3905_p2 = por %p3904_p0, %p3903_p11 }
  0x34   : > { %p3901_p13 = pneg %p3900_p10 }
  0x36   : > { %p3906_p5 = pnand %p3905_p2, %p3901_p13 }
  0x38   : > { %3909 = shalt.err (!%p3906_p5)
}
  0x39   : > { %3716 = dma.hbm_to_vmem [thread:$0]  (!%p4194_p7), %s297_s20, 128, %s299_s19, %s287_s3  }
  0x3a   : > { %s3676_s22 = smul.u32 384, %s4037_s27  ;;  %s309_s14 = scalar_lea.vmem [#allocation5], %s3675_s11 }
  0x3b   : > { %s317_s16 = sshll.u32 %s309_s14, 4  ;;  %s306_s4 = scalar_lea.sflag [#allocation6], %s305_s2  ;;  %s318_s16 = int_to_ptr.vmem [resolvable:$true] %s317_s16 }
  0x3c   : > { %s314_s29 = scalar_lea.hbm %s5935_s1, %s3676_s22  ;;  %s3932_s11 = scalar_lea.hbm %s5935_s1, 768 }
  0x3d   : > { %s315_s26 = sshll.u32 %s314_s29, 4  ;;  %s316_s26 = int_to_ptr.hbm [resolvable:$true] %s315_s26 }
  0x3e   : > { %s3925_s6 = sshra.s32 %s316_s26, 4  ;;  %s3926_s6 = int_to_ptr.hbm [resolvable:$true] %s3925_s6 }
  0x3f   : > { %s3927_s10 = scalar_lea.hbm %s3926_s6, 384  ;;  %p3933_p13 = scmp.lt.s32.totalorder %s3926_s6, %s5935_s1 }
  0x40   : > { %p3928_p5 = scmp.ne.s32.totalorder %s3926_s6, %s3927_s10  ;;  %p3934_p11 = scmp.lt.s32.totalorder %s3932_s11, %s3927_s10 }
  0x42   : > { %p3930_p8 = pnand %p3928_p5, %p3899_p9  ;;  %p3935_p0 = por %p3934_p11, %p3933_p13 }
  0x44   : > { %p3931_p10 = pneg %p3930_p8 }
  0x46   : > { %p3936_p2 = pnand %p3935_p0, %p3931_p10 }
  0x48   : > { %3939 = shalt.err (!%p3936_p2)
}
  0x49   : > { %s5983_s2 = smov 8   ;;  %s5984_s18 = smov 128  }
  0x4a   : > { %3719 = dma.hbm_to_vmem [thread:$0]  (!%p4194_p7), %s316_s26, 6144, %s318_s16, %s306_s4, %s5984_s18, %s5984_s18, %s5983_s2  }
  0x4b   : > { %329 = sbr.rel (%p4116_p3) target bundleno = 1151 (0x47f), region = 48  ;;  %s4235_s13 = sand.u32 (!%p4116_p3), 1, %s4029_s25  }
  0x4c   : > { %s3633_s22 = sshll.u32 (!%p4116_p3), %s4235_s13, 3  ;;  %s332_s14 = scalar_lea.sflag (!%p4116_p3), [#allocation3], %s4235_s13 }
  0x4d   : > { %s4239_s21 = scalar_lea.vmem (!%p4116_p3), [#allocation2], %s3633_s22 }
  0x50   : > { %4000 = dma.done.wait (%p4170_p12), %s332_s14, 128  }
  0x51   : > { %4002 = vsyncadd (%p4170_p12), %s332_s14, 4294967168  ;;  %s341_s26 = sand.u32 1, %s4111_s8   ;;  %s3677_s9 = smul.u32 384, %s4235_s13 }
  0x52   : > { %s342_s30 = scalar_lea.sflag [#allocation6], %s341_s26 }
  0x53   : > { %s4247_s16 = scalar_lea.vmem [#allocation5], %s3677_s9 }
  0x54   : > { %4004 = dma.done.wait (%p4170_p12), %s342_s30, 6144  }
  0x55   : > { %4006 = vsyncadd (%p4170_p12), %s342_s30, 4294961152 }
  0x56   : > { %4008 = dma.done.wait (%p49_p1), [#allocation6], 192  }
  0x57   : > { %4010 = vsyncadd (%p49_p1), [#allocation6], 4294967104 }
  0x58   : > { %4012 = dma.done.wait (%p49_p1), [#allocation9], 6336  }
  0x59   : > { %4014 = vsyncadd (%p49_p1), [#allocation9], 4294960960 }
  0x5a   : > { %4016 = dma.done.wait (%p49_p1), [#allocation12], 64  }
  0x5b   : > { %4018 = vsyncadd (%p49_p1), [#allocation12], 4294967232  ;;  %vm404_vm0 = vcmask 64512   ;;  %v402_v0 = vld [vmem:[%s4239_s21] sm:$0xff]  ;;  %v403_v1 = vld [vmem:[#allocation7] sm:$0xf] }
  0x5c   : > { %v571_v2 = vld [vmem:[#allocation7 + $0x4] sm:$0xf]  ;;  %v4266_v3 = vand.u32 4294901760, %v402_v0  ;;  %v406_v4 = vsel %vm404_vm0, %v403_v1, 0  ;;  %v3654_v6 = vld [vmem:[%s4247_s16 + $0xf8] sm:$0xff]  ;;  %v3653_v7 = vld [vmem:[%s4247_s16 + $0xf0] sm:$0xff] }
  0x5d   : > { %v573_v5 = vsel %vm404_vm0, %v571_v2, 0  ;;  %v4272_v8 = vand.u32 4294901760, %v406_v4  ;;  %v4276_v10 = vand.u32 4294901760, %v3654_v6  ;;  %v3652_v11 = vld [vmem:[%s4247_s16 + $0xe8] sm:$0xff]  ;;  %v4284_v13 = vand.u32 4294901760, %v3653_v7  ;;  %v3651_v14 = vld [vmem:[%s4247_s16 + $0xe0] sm:$0xff] }
  0x5e   : > { %v4274_v9 = vand.u32 4294901760, %v573_v5  ;;  %v4280_v12 = vsub.f32 %v402_v0, %v4266_v3  ;;  %500 = vmatpush.msra.mxu3 %v4266_v3  ;;  %424 = vmatpush.msra.mxu0 %v4266_v3  ;;  %v4298_v19 = vand.u32 4294901760, %v3652_v11  ;;  %v3650_v20 = vld [vmem:[%s4247_s16 + $0xd8] sm:$0xff]  ;;  %v4302_v23 = vand.u32 4294901760, %v3651_v14  ;;  %v3649_v29 = vld [vmem:[%s4247_s16 + $0xd0] sm:$0xff]  ;;  %v3648_v36 = vld [vmem:[%s4247_s16 + $0xc8] sm:$0xff] }
  0x5f   : > { %v426_v15 = vsub.f32 %v406_v4, %v4272_v8  ;;  %v4296_v18 = vsub.f32 %v3654_v6, %v4276_v10  ;;  %v4309_v25 = vsub.f32 %v3653_v7, %v4284_v13  ;;  %v4315_v28 = vand.u32 4294901760, %v3650_v20  ;;  %v3647_v40 = vld [vmem:[%s4247_s16 + $0xc0] sm:$0xff]  ;;  %v3646_v45 = vld [vmem:[%s4247_s16 + $0xb8] sm:$0xff]  ;;  %v3645_v50 = vld [vmem:[%s4247_s16 + $0xb0] sm:$0xff]  ;;  %s3638_s4 = sshll.u32 %s4235_s13, 2  ;;  %s3672_s6 = sshll.u32 %s4111_s8, 2 }
  0x60   : > { %v4289_v16 = vsub.f32 %v573_v5, %v4274_v9  ;;  %477 = vmatpush.msra.mxu2 %v4280_v12  ;;  %v4293_v17 = vand.u32 4294901760, %v4280_v12  ;;  %v4322_v32 = vsub.f32 %v3652_v11, %v4298_v19  ;;  %v4325_v35 = vsub.f32 %v3651_v14, %v4302_v23  ;;  %v3644_v55 = vld [vmem:[%s4247_s16 + $0xa8] sm:$0xff]  ;;  %v3643_v61 = vld [vmem:[%s4247_s16 + $0xa0] sm:$0xff]  ;;  %v3642_v5 = vld [vmem:[%s4247_s16 + $0x98] sm:$0xff]  ;;  %s3486_s19 = scalar_lea.hbm %s5941_s7, %s3672_s6  ;;  %s401_s11 = scalar_lea.vmem [#allocation13], %s3638_s4 }
  0x61   : > { %480 = vmatmul.f32.vlgmr.msra.gmra.mxu2 %v426_v15  ;;  %v427_v21 = vand.u32 4294901760, %v426_v15  ;;  %v781_v31 = vand.u32 4294901760, %v4296_v18  ;;  %v787_v37 = vand.u32 4294901760, %v4309_v25  ;;  %v4331_v38 = vand.u32 4294901760, %v3649_v29  ;;  %s3488_s20 = sshll.u32 %s401_s11, 4  ;;  %s3490_s12 = sshll.u32 %s3486_s19, 4  ;;  %s3489_s20 = int_to_ptr.vmem [resolvable:$true] %s3488_s20  ;;  %s3491_s12 = int_to_ptr.hbm [resolvable:$true] %s3490_s12 }
  0x62   : > { %v594_v22 = vand.u32 4294901760, %v4289_v16  ;;  %v452_v24 = vsub.f32 %v4280_v12, %v4293_v17  ;;  %591 = vmatpush.msrb.mxu2 %v4266_v3  ;;  %526 = vmatpush.msrb.mxu0 %v4293_v17  ;;  %v4335_v39 = vsub.f32 %v3650_v20, %v4315_v28  ;;  %v793_v42 = vand.u32 4294901760, %v4322_v32  ;;  %s3476_s2 = scalar_lea.sflag [#allocation4], %s4235_s13  ;;  %s3969_s8 = sshra.s32 %s3491_s12, 4  ;;  %s3970_s8 = int_to_ptr.hbm [resolvable:$true] %s3969_s8 }
  0x63   : > { %504 = vmatmul.f32.vlgmr.msra.gmra.mxu3 %v427_v21  ;;  %v428_v26 = vsub.f32 %v426_v15, %v427_v21  ;;  %v782_v41 = vsub.f32 %v4296_v18, %v781_v31  ;;  %v4344_v43 = vand.u32 4294901760, %v3648_v36  ;;  %v799_v44 = vand.u32 4294901760, %v4325_v35  ;;  %v3641_v15 = vld [vmem:[%s4247_s16 + $0x90] sm:$0xff]  ;;  %s3971_s18 = scalar_lea.hbm %s3970_s8, 4  ;;  %s3975_s26 = scalar_lea.hbm %s5941_s7, 8 }
  0x64   : > { %v595_v27 = vsub.f32 %v4289_v16, %v594_v22  ;;  %693 = vmatpush.msra.mxu2 %v4293_v17  ;;  %v4318_v30 = vand.u32 4294901760, %v452_v24  ;;  %v788_v46 = vsub.f32 %v4309_v25, %v787_v37  ;;  %v4355_v47 = vsub.f32 %v3649_v29, %v4331_v38  ;;  %p3972_p1 = scmp.ne.s32.totalorder %s3970_s8, %s3971_s18  ;;  %p3976_p7 = scmp.lt.s32.totalorder %s3970_s8, %s5941_s7 }
  0x65   : > { %v429_v33 = vand.u32 4294901760, %v428_v26  ;;  %v4357_v48 = vand.u32 4294901760, %v3647_v40  ;;  %v805_v49 = vand.u32 4294901760, %v4335_v39  ;;  %v783_v51 = vand.u32 4294901760, %v782_v41  ;;  %v3639_v41 = vld [vmem:[%s4247_s16 + $0x80] sm:$0xff]  ;;  %p3977_p9 = scmp.lt.s32.totalorder %s3975_s26, %s3971_s18 }
  0x66   : > { %v596_v34 = vand.u32 4294901760, %v595_v27  ;;  %454 = vmatpush.msra.mxu1 %v4318_v30  ;;  %621 = vmatpush.msrb.mxu3 %v4318_v30  ;;  %v794_v52 = vsub.f32 %v4322_v32, %v793_v42  ;;  %v4368_v53 = vsub.f32 %v3648_v36, %v4344_v43  ;;  %v4370_v54 = vand.u32 4294901760, %v3646_v45  ;;  %v3640_v27 = vld [vmem:[%s4247_s16 + $0x88] sm:$0xff]  ;;  %p3973_p3 = pnand %p3972_p1, %p4179_p4 }
  0x67   : > { %430 = vmatmul.f32.vlgmr.msra.gmra.mxu0 %v429_v33  ;;  %456 = vmatmul.f32.vlgmr.msra.gmra.mxu1 %v4272_v8  ;;  %v800_v56 = vsub.f32 %v4325_v35, %v799_v44  ;;  %v789_v57 = vand.u32 4294901760, %v788_v46  ;;  %v811_v58 = vand.u32 4294901760, %v4355_v47  ;;  %v4380_v59 = vsub.f32 %v3647_v40, %v4357_v48  ;;  %p3978_p5 = por %p3977_p9, %p3976_p7 }
  0x68   : > { %548 = vmatpush.msrb.mxu1 %v4266_v3  ;;  %644 = vmatpush.msra.mxu0 %v4280_v12  ;;  %v4382_v60 = vand.u32 4294901760, %v3645_v50  ;;  %v4387_v62 = vand.u32 4294901760, %v3644_v55  ;;  %v795_v63 = vand.u32 4294901760, %v794_v52  ;;  %v806_v0 = vsub.f32 %v4335_v39, %v805_v49  ;;  %p3974_p12 = pneg %p3973_p3 }
  0x69   : > { %597 = vmatmul.f32.vlgmr.msrb.gmra.mxu2 %v596_v34  ;;  %715 = vmatpush.msra.mxu3 %v4266_v3  ;;  %v817_v1 = vand.u32 4294901760, %v4368_v53  ;;  %v4395_v2 = vsub.f32 %v3646_v45, %v4370_v54  ;;  %v4399_v4 = vand.u32 4294901760, %v3643_v61  ;;  %v801_v6 = vand.u32 4294901760, %v800_v56 }
  0x6a   : > { %667 = vmatpush.msra.mxu1 %v4266_v3  ;;  %882 = vmatpush.msrb.mxu2 %v4296_v18  ;;  %v812_v7 = vsub.f32 %v4355_v47, %v811_v58  ;;  %v4408_v11 = vsub.f32 %v3645_v50, %v4382_v60  ;;  %v4413_v14 = vsub.f32 %v3644_v55, %v4387_v62  ;;  %v807_v20 = vand.u32 4294901760, %v806_v0  ;;  %p3979_p8 = pnand %p3978_p5, %p3974_p12 }
  0x6b   : > { %623 = vmatmul.f32.vlgmr.msrb.gmra.mxu3 %v4274_v9  ;;  %v818_v21 = vsub.f32 %v4368_v53, %v817_v1  ;;  %v829_v24 = vand.u32 4294901760, %v4395_v2  ;;  %v4421_v26 = vand.u32 4294901760, %v3642_v5  ;;  %v4434_v36 = vand.u32 4294901760, %v3641_v15 }
  0x6c   : > { %885 = vmatpush.msrb.mxu2 %v4309_v25  ;;  %935 = vmatpush.msrb.mxu3 %v4276_v10  ;;  %v813_v29 = vand.u32 4294901760, %v812_v7  ;;  %v835_v34 = vand.u32 4294901760, %v4408_v11  ;;  %v841_v40 = vand.u32 4294901760, %v4413_v14  ;;  %v4460_v56 = vand.u32 4294901760, %v3639_v41 }
  0x6d   : > { %v819_v45 = vand.u32 4294901760, %v818_v21  ;;  %v830_v46 = vsub.f32 %v4395_v2, %v829_v24  ;;  %v4446_v50 = vsub.f32 %v3642_v5, %v4421_v26  ;;  %v4458_v55 = vsub.f32 %v3641_v15, %v4434_v36 }
  0x6e   : > { %888 = vmatpush.msrb.mxu2 %v4322_v32  ;;  %937 = vmatpush.msrb.mxu3 %v4284_v13  ;;  %v836_v52 = vsub.f32 %v4408_v11, %v835_v34  ;;  %v4480_v15 = vsub.f32 %v3639_v41, %v4460_v56  ;;  %vm2651_vm1 = vcmask 31744   ;;  %vm2655_vm2 = vcmask 1043456  }
  0x6f   : > { %528 = vmatmul.f32.vlgmr.msrb.gmra.mxu0 %v4272_v8  ;;  %550 = vmatmul.f32.vlgmr.msrb.gmra.mxu1 %v4272_v8  ;;  %v823_v8 = vand.u32 4294901760, %v4380_v59  ;;  %v859_v7 = vand.u32 4294901760, %v4458_v55 }
  0x70   : > { %784 = vmatpush.msrb.mxu1 %v783_v51  ;;  %739 = vmatpush.msrb.mxu0 %v4276_v10  ;;  %v4448_v51 = vand.u32 4294901760, %v3640_v27  ;;  %v837_v5 = vand.u32 4294901760, %v836_v52  ;;  %v871_v41 = vand.u32 4294901760, %v4480_v15 }
  0x71   : > { %695 = vmatmul.f32.vlgmr.msra.gmra.mxu2 %v4274_v9  ;;  %939 = vmatpush.msrb.mxu3 %v4298_v19  ;;  %v824_v33 = vsub.f32 %v4380_v59, %v823_v8 }
  0x72   : > { %790 = vmatpush.msrb.mxu1 %v789_v57  ;;  %891 = vmatpush.msrb.mxu2 %v4325_v35  ;;  %v831_v57 = vand.u32 4294901760, %v830_v46  ;;  %v4470_v0 = vsub.f32 %v3640_v27, %v4448_v51  ;;  %v872_v52 = vsub.f32 %v4480_v15, %v871_v41 }
  0x73   : > { %717 = vmatmul.f32.vlgmr.msra.gmra.mxu3 %v4274_v9  ;;  %741 = vmatpush.msrb.mxu0 %v4284_v13  ;;  %v4426_v9 = vsub.f32 %v3643_v61, %v4399_v4  ;;  %v842_v61 = vsub.f32 %v4413_v14, %v841_v40 }
  0x74   : > { %796 = vmatpush.msrb.mxu1 %v795_v63  ;;  %894 = vmatpush.msrb.mxu2 %v4335_v39  ;;  %v853_v63 = vand.u32 4294901760, %v4446_v50  ;;  %v865_v27 = vand.u32 4294901760, %v4470_v0  ;;  %v565_v39 = vld [vmem:[%s4247_s16 + $0x58] sm:$0xff] }
  0x75   : > { %941 = vmatpush.msrb.mxu3 %v4302_v23  ;;  %743 = vmatpush.msrb.mxu0 %v4298_v19 }
  0x76   : > { %802 = vmatpush.msrb.mxu1 %v801_v6  ;;  %897 = vmatpush.msrb.mxu2 %v4355_v47  ;;  %v854_v21 = vsub.f32 %v4446_v50, %v853_v63  ;;  %v866_v46 = vsub.f32 %v4470_v0, %v865_v27  ;;  %v4604_v47 = vand.u32 4294901760, %v565_v39 }
  0x77   : > { %647 = vmatmul.f32.vlgmr.msra.gmra.mxu0 %v4289_v16  ;;  %671 = vmatmul.f32.vlgmr.msra.gmra.mxu1 %v594_v22  ;;  %v847_v16 = vand.u32 4294901760, %v4426_v9  ;;  %v825_v22 = vand.u32 4294901760, %v824_v33  ;;  %v860_v33 = vsub.f32 %v4458_v55, %v859_v7 }
  0x78   : > { %808 = vmatpush.msrb.mxu1 %v807_v20  ;;  %943 = vmatpush.msrb.mxu3 %v4315_v28  ;;  %v843_v20 = vand.u32 4294901760, %v842_v61  ;;  %v569_v61 = vld [vmem:[%s4247_s16 + $0x78] sm:$0xff] }
  0x79   : > { %745 = vmatpush.msrb.mxu0 %v4302_v23  ;;  %900 = vmatpush.msrb.mxu2 %v4368_v53  ;;  %v848_v6 = vsub.f32 %v4426_v9, %v847_v16 }
  0x7a   : > { %814 = vmatpush.msrb.mxu1 %v813_v29  ;;  %945 = vmatpush.msrb.mxu3 %v4331_v38 }
  0x7b   : > { %747 = vmatpush.msrb.mxu0 %v4315_v28  ;;  %903 = vmatpush.msrb.mxu2 %v4380_v59  ;;  %v849_v29 = vand.u32 4294901760, %v848_v6  ;;  %v4517_v6 = vand.u32 4294901760, %v569_v61  ;;  %v4617_v59 = vsub.f32 %v565_v39, %v4604_v47 }
  0x7c   : > { %820 = vmatpush.msrb.mxu1 %v819_v45  ;;  %947 = vmatpush.msrb.mxu3 %v4344_v43  ;;  %v855_v45 = vand.u32 4294901760, %v854_v21 }
  0x7d   : > { %749 = vmatpush.msrb.mxu0 %v4331_v38  ;;  %906 = vmatpush.msrb.mxu2 %v4395_v2  ;;  %v1146_v2 = vand.u32 4294901760, %v4617_v59 }
  0x7e   : > { %826 = vmatpush.msrb.mxu1 %v825_v22  ;;  %949 = vmatpush.msrb.mxu3 %v4357_v48  ;;  %v861_v22 = vand.u32 4294901760, %v860_v33 }
  0x7f   : > { %751 = vmatpush.msrb.mxu0 %v4344_v43  ;;  %909 = vmatpush.msrb.mxu2 %v4408_v11 }
  0x80   : > { %832 = vmatpush.msrb.mxu1 %v831_v57  ;;  %951 = vmatpush.msrb.mxu3 %v4370_v54  ;;  %v867_v57 = vand.u32 4294901760, %v866_v46 }
  0x81   : > { %753 = vmatpush.msrb.mxu0 %v4357_v48  ;;  %912 = vmatpush.msrb.mxu2 %v4413_v14  ;;  %v562_v14 = vld [vmem:[%s4247_s16 + $0x40] sm:$0xff] }
  0x82   : > { %838 = vmatpush.msrb.mxu1 %v837_v5  ;;  %953 = vmatpush.msrb.mxu3 %v4382_v60  ;;  %v873_v5 = vand.u32 4294901760, %v872_v52 }
  0x83   : > { %755 = vmatpush.msrb.mxu0 %v4370_v54  ;;  %915 = vmatpush.msrb.mxu2 %v4426_v9  ;;  %v4637_v9 = vand.u32 4294901760, %v562_v14 }
  0x84   : > { %844 = vmatpush.msrb.mxu1 %v843_v20  ;;  %955 = vmatpush.msrb.mxu3 %v4387_v62 }
  0x85   : > { %757 = vmatpush.msrb.mxu0 %v4382_v60  ;;  %918 = vmatpush.msrb.mxu2 %v4446_v50 }
  0x86   : > { %850 = vmatpush.msrb.mxu1 %v849_v29  ;;  %957 = vmatpush.msrb.mxu3 %v4399_v4 }
  0x87   : > { %759 = vmatpush.msrb.mxu0 %v4387_v62  ;;  %921 = vmatpush.msrb.mxu2 %v4458_v55 }
  0x88   : > { %856 = vmatpush.msrb.mxu1 %v855_v45  ;;  %959 = vmatpush.msrb.mxu3 %v4421_v26 }
  0x89   : > { %761 = vmatpush.msrb.mxu0 %v4399_v4  ;;  %924 = vmatpush.msrb.mxu2 %v4470_v0 }
  0x8a   : > { %862 = vmatpush.msrb.mxu1 %v861_v22  ;;  %961 = vmatpush.msrb.mxu3 %v4434_v36  ;;  %v558_v22 = vld [vmem:[%s4247_s16 + $0x20] sm:$0xff] }
  0x8b   : > { %763 = vmatpush.msrb.mxu0 %v4421_v26  ;;  %927 = vmatpush.msrb.mxu2 %v4480_v15 }
  0x8c   : > { %868 = vmatpush.msrb.mxu1 %v867_v57  ;;  %963 = vmatpush.msrb.mxu3 %v4448_v51 }
  0x8d   : > { %1080 = vmatpush.msra.mxu2 %v4517_v6  ;;  %765 = vmatpush.msrb.mxu0 %v4434_v36 }
  0x8e   : > { %874 = vmatpush.msrb.mxu1 %v873_v5  ;;  %965 = vmatpush.msrb.mxu3 %v4460_v56 }
  0x8f   : > { %767 = vmatpush.msrb.mxu0 %v4448_v51 }
  0x90   : > { %1043 = vmatpush.msra.mxu1 %v4276_v10  ;;  %v4574_v10 = vsub.f32 %v569_v61, %v4517_v6  ;;  %v4681_v61 = vand.u32 4294901760, %v558_v22 }
  0x91   : > { %769 = vmatpush.msrb.mxu0 %v4460_v56 }
  0x92   : > { %1045 = vmatpush.msra.mxu1 %v4284_v13  ;;  %v568_v13 = vld [vmem:[%s4247_s16 + $0x70] sm:$0xff] }
  0x93   : > { %976 = vmatpush.msra.mxu0 %v781_v31  ;;  %v4577_v18 = vand.u32 4294901760, %v568_v13  ;;  %v566_v31 = vld [vmem:[%s4247_s16 + $0x60] sm:$0xff] }
  0x94   : > { %1047 = vmatpush.msra.mxu1 %v4298_v19  ;;  %v567_v19 = vld [vmem:[%s4247_s16 + $0x68] sm:$0xff] }
  0x95   : > { %980 = vmatpush.msra.mxu0 %v787_v37  ;;  %1082 = vmatpush.msra.mxu2 %v4577_v18  ;;  %v4582_v25 = vand.u32 4294901760, %v567_v19  ;;  %v4593_v37 = vand.u32 4294901760, %v566_v31 }
  0x96   : > { %1049 = vmatpush.msra.mxu1 %v4302_v23  ;;  %v1122_v23 = vand.u32 4294901760, %v4574_v10 }
  0x97   : > { %984 = vmatpush.msra.mxu0 %v793_v42  ;;  %1084 = vmatpush.msra.mxu2 %v4582_v25 }
  0x98   : > { %1051 = vmatpush.msra.mxu1 %v4315_v28  ;;  %v4585_v28 = vsub.f32 %v568_v13, %v4577_v18  ;;  %v1123_v32 = vsub.f32 %v4574_v10, %v1122_v23 }
  0x99   : > { %988 = vmatpush.msra.mxu0 %v799_v44  ;;  %1086 = vmatpush.msra.mxu2 %v4593_v37 }
  0x9a   : > { %1053 = vmatpush.msra.mxu1 %v4331_v38  ;;  %v1128_v35 = vand.u32 4294901760, %v4585_v28  ;;  %v4596_v38 = vsub.f32 %v567_v19, %v4582_v25  ;;  %v1124_v42 = vand.u32 4294901760, %v1123_v32  ;;  %v557_v19 = vld [vmem:[%s4247_s16 + $0x18] sm:$0xff] }
  0x9b   : > { %992 = vmatpush.msra.mxu0 %v805_v49  ;;  %v564_v49 = vld [vmem:[%s4247_s16 + $0x50] sm:$0xff]  ;;  %1088 = vmatpush.msra.mxu2 %v4604_v47 }
  0x9c   : > { %1055 = vmatpush.msra.mxu1 %v4344_v43  ;;  %v1129_v43 = vsub.f32 %v4585_v28, %v1128_v35  ;;  %v1134_v44 = vand.u32 4294901760, %v4596_v38  ;;  %1125 = vmatpush.msra.mxu3 %v1124_v42  ;;  %v4692_v42 = vand.u32 4294901760, %v557_v19 }
  0x9d   : > { %996 = vmatpush.msra.mxu0 %v811_v58  ;;  %v4614_v58 = vand.u32 4294901760, %v564_v49 }
  0x9e   : > { %1057 = vmatpush.msra.mxu1 %v4357_v48  ;;  %v4607_v48 = vsub.f32 %v566_v31, %v4593_v37  ;;  %v1130_v53 = vand.u32 4294901760, %v1129_v43  ;;  %v4695_v43 = vsub.f32 %v558_v22, %v4681_v61 }
  0x9f   : > { %1000 = vmatpush.msra.mxu0 %v817_v1  ;;  %1090 = vmatpush.msra.mxu2 %v4614_v58 }
  0xa0   : > { %1059 = vmatpush.msra.mxu1 %v4370_v54  ;;  %v1135_v54 = vsub.f32 %v4596_v38, %v1134_v44  ;;  %1131 = vmatpush.msra.mxu3 %v1130_v53 }
  0xa1   : > { %1004 = vmatpush.msra.mxu0 %v823_v8  ;;  %v4626_v8 = vsub.f32 %v564_v49, %v4614_v58  ;;  %v556_v49 = vld [vmem:[%s4247_s16 + $0x10] sm:$0xff] }
  0xa2   : > { %1061 = vmatpush.msra.mxu1 %v4382_v60  ;;  %v1140_v60 = vand.u32 4294901760, %v4607_v48  ;;  %v1136_v1 = vand.u32 4294901760, %v1135_v54 }
  0xa3   : > { %1008 = vmatpush.msra.mxu0 %v829_v24  ;;  %v1147_v24 = vsub.f32 %v4617_v59, %v1146_v2 }
  0xa4   : > { %1063 = vmatpush.msra.mxu1 %v4387_v62  ;;  %v563_v62 = vld [vmem:[%s4247_s16 + $0x48] sm:$0xff]  ;;  %v1141_v11 = vsub.f32 %v4607_v48, %v1140_v60  ;;  %1137 = vmatpush.msra.mxu3 %v1136_v1  ;;  %v4705_v1 = vsub.f32 %v557_v19, %v4692_v42 }
  0xa5   : > { %1012 = vmatpush.msra.mxu0 %v835_v34  ;;  %v1148_v50 = vand.u32 4294901760, %v1147_v24 }
  0xa6   : > { %1065 = vmatpush.msra.mxu1 %v4399_v4  ;;  %v4623_v4 = vand.u32 4294901760, %v563_v62 }
  0xa7   : > { %1016 = vmatpush.msra.mxu0 %v841_v40  ;;  %v561_v40 = vld [vmem:[%s4247_s16 + $0x38] sm:$0xff] }
  0xa8   : > { %1067 = vmatpush.msra.mxu1 %v4421_v26  ;;  %1092 = vmatpush.msra.mxu2 %v4623_v4  ;;  %v1152_v26 = vand.u32 4294901760, %v4626_v8  ;;  %v4640_v34 = vsub.f32 %v563_v62, %v4623_v4  ;;  %v4648_v55 = vand.u32 4294901760, %v561_v40  ;;  %v4702_v62 = vand.u32 4294901760, %v556_v49 }
  0xa9   : > { %1020 = vmatpush.msra.mxu0 %v847_v16 }
  0xaa   : > { %1069 = vmatpush.msra.mxu1 %v4434_v36  ;;  %v1142_v36 = vand.u32 4294901760, %v1141_v11  ;;  %1094 = vmatpush.msra.mxu2 %v4637_v9  ;;  %v5954_v16 = vand.u32 4294901760, %v4640_v34  ;;  %v4661_v20 = vsub.f32 %v561_v40, %v4648_v55  ;;  %v5948_v11 = vand.u32 4294901760, %v4695_v43 }
  0xab   : > { %1024 = vmatpush.msra.mxu0 %v853_v63  ;;  %v560_v63 = vld [vmem:[%s4247_s16 + $0x30] sm:$0xff] }
  0xac   : > { %1071 = vmatpush.msra.mxu1 %v4448_v51  ;;  %v1153_v51 = vsub.f32 %v4626_v8, %v1152_v26  ;;  %1143 = vmatpush.msra.mxu3 %v1142_v36  ;;  %v4658_v15 = vand.u32 4294901760, %v560_v63  ;;  %v5951_v33 = vand.u32 4294901760, %v4661_v20  ;;  %v5947_v36 = vand.u32 4294901760, %v4705_v1 }
  0xad   : > { %1028 = vmatpush.msra.mxu0 %v859_v7  ;;  %v1159_v7 = vsub.f32 %v4640_v34, %v5954_v16  ;;  %1096 = vmatpush.msra.mxu2 %v4648_v55 }
  0xae   : > { %1073 = vmatpush.msra.mxu1 %v4460_v56  ;;  %v4651_v56 = vsub.f32 %v562_v14, %v4637_v9  ;;  %v1154_v0 = vand.u32 4294901760, %v1153_v51  ;;  %1149 = vmatpush.msra.mxu3 %v1148_v50  ;;  %v4670_v45 = vsub.f32 %v560_v63, %v4658_v15  ;;  %v1171_v52 = vsub.f32 %v4661_v20, %v5951_v33  ;;  %v555_v14 = vld [vmem:[%s4247_s16 + $0x8] sm:$0xff] }
  0xaf   : > { %1032 = vmatpush.msra.mxu0 %v865_v27  ;;  %v559_v27 = vld [vmem:[%s4247_s16 + $0x28] sm:$0xff]  ;;  %v1160_v29 = vand.u32 4294901760, %v1159_v7  ;;  %1098 = vmatpush.msra.mxu2 %v4658_v15  ;;  %v4711_v40 = vand.u32 4294901760, %v555_v14  ;;  %v4714_v50 = vsub.f32 %v556_v49, %v4702_v62  ;;  %v1189_v51 = vsub.f32 %v4695_v43, %v5948_v11  ;;  %v554_v7 = vld [vmem:[%s4247_s16] sm:$0xff] }
  0xb0   : > { %v5953_v21 = vand.u32 4294901760, %v4651_v56  ;;  %1155 = vmatpush.msra.mxu3 %v1154_v0  ;;  %v5950_v57 = vand.u32 4294901760, %v4670_v45  ;;  %v1172_v31 = vand.u32 4294901760, %v1171_v52  ;;  %v1195_v63 = vsub.f32 %v4705_v1, %v5947_v36 }
  0xb1   : > { %1036 = vmatpush.msra.mxu0 %v871_v41  ;;  %v4667_v41 = vand.u32 4294901760, %v559_v27  ;;  %v5945_v0 = vand.u32 4294901760, %v4714_v50 }
  0xb2   : > { %v1165_v46 = vsub.f32 %v4651_v56, %v5953_v21  ;;  %1161 = vmatpush.msra.mxu3 %v1160_v29  ;;  %v1177_v32 = vsub.f32 %v4670_v45, %v5950_v57  ;;  %v4725_v29 = vand.u32 4294901760, %v554_v7  ;;  %v1196_v22 = vand.u32 4294901760, %v1195_v63 }
  0xb3   : > { %1100 = vmatpush.msra.mxu2 %v4667_v41  ;;  %v4684_v5 = vsub.f32 %v559_v27, %v4667_v41  ;;  %v1190_v27 = vand.u32 4294901760, %v1189_v51  ;;  %v1201_v52 = vsub.f32 %v4714_v50, %v5945_v0 }
  0xb4   : > { %v1166_v13 = vand.u32 4294901760, %v1165_v46  ;;  %v1178_v53 = vand.u32 4294901760, %v1177_v32  ;;  %v4728_v46 = vsub.f32 %v555_v14, %v4711_v40  ;;  %v4736_v19 = vsub.f32 %v554_v7, %v4725_v29 }
  0xb5   : > { %1102 = vmatpush.msra.mxu2 %v4681_v61  ;;  %v5949_v39 = vand.u32 4294901760, %v4684_v5 }
  0xb6   : > { %1167 = vmatpush.msra.mxu3 %v1166_v13  ;;  %v5946_v13 = vand.u32 4294901760, %v4728_v46  ;;  %v5952_v49 = vand.u32 4294901760, %v4736_v19 }
  0xb7   : > { %v1183_v54 = vsub.f32 %v4684_v5, %v5949_v39  ;;  %1104 = vmatpush.msra.mxu2 %v4692_v42 }
  0xb8   : > { %1173 = vmatpush.msra.mxu3 %v1172_v31  ;;  %v1202_v31 = vand.u32 4294901760, %v1201_v52  ;;  %v1207_v32 = vsub.f32 %v4728_v46, %v5946_v13 }
  0xb9   : > { %v1184_v24 = vand.u32 4294901760, %v1183_v54  ;;  %1106 = vmatpush.msra.mxu2 %v4702_v62  ;;  %v1213_v54 = vsub.f32 %v4736_v19, %v5952_v49 }
  0xba   : > { %1179 = vmatpush.msra.mxu3 %v1178_v53  ;;  %v1208_v53 = vand.u32 4294901760, %v1207_v32 }
  0xbb   : > { %1108 = vmatpush.msra.mxu2 %v4711_v40  ;;  %v1214_v14 = vand.u32 4294901760, %v1213_v54 }
  0xbc   : > { %1185 = vmatpush.msra.mxu3 %v1184_v24 }
  0xbd   : > { %1110 = vmatpush.msra.mxu2 %v4725_v29 }
  0xbe   : > { %1191 = vmatpush.msra.mxu3 %v1190_v27 }
  0xc0   : > { %1197 = vmatpush.msra.mxu3 %v1196_v22 }
  0xc2   : > { %1203 = vmatpush.msra.mxu3 %v1202_v31 }
  0xc4   : > { %1209 = vmatpush.msra.mxu3 %v1208_v53 }
  0xc6   : > { %1215 = vmatpush.msra.mxu3 %v1214_v14 }
  0xe4   : > { %v431_v24 = vpop.f32.mrf.mxu0  ;;  %v457_v51 = vpop.f32.mrf.mxu1 }
  0xe5   : > { %v481_v63 = vpop.f32.mrf.mxu2  ;;  %v458_v7 = vadd.f32 %v457_v51, %v431_v24 }
  0xe6   : > { %v505_v27 = vpop.f32.mrf.mxu3 }
  0xe7   : > { %v482_v22 = vadd.f32 %v481_v63, %v458_v7 }
  0xe9   : > { %v506_v36 = vadd.f32 %v505_v27, %v482_v22 }
  0xec   : > { %v529_v52 = vpop.f32.mrf.mxu0  ;;  %v551_v0 = vpop.f32.mrf.mxu1 }
  0xed   : > { %v598_v13 = vpop.f32.mrf.mxu2  ;;  %v530_v11 = vadd.f32 %v529_v52, %v506_v36 }
  0xee   : > { %v624_v31 = vpop.f32.mrf.mxu3 }
  0xef   : > { %v625_v32 = vadd.f32 %v624_v31, %v598_v13  ;;  %v552_v39 = vadd.f32 %v551_v0, %v530_v11  ;;  %v3664_v13 = vld [vmem:[%s4247_s16 + $0x148] sm:$0xff]  ;;  %v3663_v31 = vld [vmem:[%s4247_s16 + $0x140] sm:$0xff] }
  0xf0   : > { %v4914_v22 = vand.u32 4294901760, %v3664_v13 }
  0xf1   : > { %v4745_v14 = vand.u32 4294901760, %v552_v39 }
  0xf3   : > { %v4748_v51 = vsub.f32 %v552_v39, %v4745_v14 }
  0xf4   : > { %v648_v57 = vpop.f32.mrf.mxu0  ;;  %v672_v33 = vpop.f32.mrf.mxu1 }
  0xf5   : > { %v649_v49 = vadd.f32 %v648_v57, %v625_v32  ;;  %v696_v53 = vpop.f32.mrf.mxu2  ;;  %v1113_v36 = vand.u32 4294901760, %v4748_v51 }
  0xf6   : > { %v718_v21 = vpop.f32.mrf.mxu3 }
  0xf7   : > { %v673_v54 = vadd.f32 %v672_v33, %v649_v49 }
  0xf9   : > { %v697_v16 = vadd.f32 %v696_v53, %v673_v54  ;;  %v4922_v54 = vsub.f32 %v3664_v13, %v4914_v22 }
  0xfb   : > { %v719_v24 = vadd.f32 %v718_v21, %v697_v16  ;;  %v1114_v16 = vsub.f32 %v4748_v51, %v1113_v36 }
  0xfd   : > { %v770_v63 = vand.u32 4294901760, %v719_v24 }
  0xff   : > { %v771_v7 = vsub.f32 %v719_v24, %v770_v63  ;;  %876 = vmatmul.f32.vlgmr.msrb.gmra.mxu1 %v770_v63 }
 0x100   : > { %1276 = vmatpush.msrb.mxu1 %v4517_v6 }
 0x101   : > { %v772_v11 = vand.u32 4294901760, %v771_v7  ;;  %930 = vmatmul.f32.vlgmr.msrb.gmra.mxu2 %v771_v7 }
 0x102   : > { %1278 = vmatpush.msrb.mxu1 %v4577_v18  ;;  %1317 = vmatpush.msrb.mxu2 %v1122_v23  ;;  %v1115_v23 = vand.u32 4294901760, %v1114_v16  ;;  %v3661_v16 = vld [vmem:[%s4247_s16 + $0x130] sm:$0xff] }
 0x103   : > { %v773_v33 = vsub.f32 %v771_v7, %v772_v11  ;;  %969 = vmatmul.f32.vlgmr.msrb.gmra.mxu3 %v772_v11  ;;  %v1667_v7 = vand.u32 4294901760, %v4922_v54 }
 0x104   : > { %1280 = vmatpush.msrb.mxu1 %v4582_v25  ;;  %1321 = vmatpush.msrb.mxu2 %v1128_v35  ;;  %v5989_v35 = vand.u32 4294901760, %v4684_v5 }
 0x105   : > { %1384 = vmatpush.msrb.mxu3 %v4517_v6  ;;  %v774_v21 = vand.u32 4294901760, %v773_v33  ;;  %v5985_v6 = vand.u32 4294901760, %v4640_v34 }
 0x106   : > { %1282 = vmatpush.msrb.mxu1 %v4593_v37  ;;  %1325 = vmatpush.msrb.mxu2 %v1134_v44  ;;  %v5991_v44 = vand.u32 4294901760, %v4705_v1 }
 0x107   : > { %1386 = vmatpush.msrb.mxu3 %v4577_v18  ;;  %775 = vmatmul.f32.vlgmr.msrb.gmra.mxu0 %v774_v21  ;;  %v5987_v18 = vand.u32 4294901760, %v4661_v20 }
 0x108   : > { %1075 = vmatmul.f32.vlgmr.msra.gmra.mxu1 %v770_v63  ;;  %1223 = vmatpush.msrb.mxu0 %v4574_v10  ;;  %v5986_v10 = vand.u32 4294901760, %v4651_v56 }
 0x109   : > { %1284 = vmatpush.msrb.mxu1 %v4604_v47  ;;  %1329 = vmatpush.msrb.mxu2 %v1140_v60  ;;  %v5994_v60 = vand.u32 4294901760, %v4736_v19 }
 0x10a   : > { %1388 = vmatpush.msrb.mxu3 %v4582_v25  ;;  %1116 = vmatmul.f32.vlgmr.msra.gmra.mxu2 %v1115_v23  ;;  %v5988_v25 = vand.u32 4294901760, %v4670_v45  ;;  %v1668_v23 = vsub.f32 %v4922_v54, %v1667_v7 }
 0x10b   : > { %1226 = vmatpush.msrb.mxu0 %v4585_v28  ;;  %1286 = vmatpush.msrb.mxu1 %v4614_v58  ;;  %v1421_v28 = vld [vmem:[#allocation7 + $0x8] sm:$0xf] }
 0x10c   : > { %1333 = vmatpush.msrb.mxu2 %v1146_v2  ;;  %1390 = vmatpush.msrb.mxu3 %v4593_v37  ;;  %v1423_v37 = vsel %vm404_vm0, %v1421_v28, 0  ;;  %v1669_v28 = vand.u32 4294901760, %v1668_v23 }
 0x10d   : > { %1217 = vmatmul.f32.vlgmr.msra.gmra.mxu3 %v4745_v14  ;;  %1229 = vmatpush.msrb.mxu0 %v4596_v38  ;;  %v5990_v38 = vand.u32 4294901760, %v4695_v43 }
 0x10e   : > { %1288 = vmatpush.msrb.mxu1 %v4623_v4  ;;  %1337 = vmatpush.msrb.mxu2 %v1152_v26  ;;  %v3669_v26 = vld [vmem:[%s4247_s16 + $0x170] sm:$0xff] }
 0x10f   : > { %1392 = vmatpush.msrb.mxu3 %v4604_v47  ;;  %1232 = vmatpush.msrb.mxu0 %v4607_v48  ;;  %v1442_v47 = vand.u32 4294901760, %v1423_v37  ;;  %v5992_v48 = vand.u32 4294901760, %v4714_v50 }
 0x110   : > { %1290 = vmatpush.msrb.mxu1 %v4637_v9  ;;  %1341 = vmatpush.msrb.mxu2 %v5985_v6 }
 0x111   : > { %1394 = vmatpush.msrb.mxu3 %v4614_v58  ;;  %1038 = vmatmul.f32.vlgmr.msra.gmra.mxu0 %v770_v63  ;;  %v5993_v58 = vand.u32 4294901760, %v4728_v46 }
 0x112   : > { %1235 = vmatpush.msrb.mxu0 %v4617_v59  ;;  %1292 = vmatpush.msrb.mxu1 %v4648_v55  ;;  %v1443_v59 = vsub.f32 %v1423_v37, %v1442_v47 }
 0x113   : > { %1345 = vmatpush.msrb.mxu2 %v5986_v10  ;;  %1396 = vmatpush.msrb.mxu3 %v4623_v4 }
 0x114   : > { %1238 = vmatpush.msrb.mxu0 %v4626_v8  ;;  %1294 = vmatpush.msrb.mxu1 %v4658_v15  ;;  %v1444_v2 = vand.u32 4294901760, %v1443_v59 }
 0x115   : > { %1349 = vmatpush.msrb.mxu2 %v5987_v18  ;;  %1398 = vmatpush.msrb.mxu3 %v4637_v9  ;;  %v4954_v18 = vand.u32 4294901760, %v3661_v16 }
 0x116   : > { %1241 = vmatpush.msrb.mxu0 %v4640_v34  ;;  %1296 = vmatpush.msrb.mxu1 %v4667_v41  ;;  %v1445_v4 = vsub.f32 %v1443_v59, %v1444_v2  ;;  %v4854_v34 = vand.u32 4294901760, %v3669_v26 }
 0x117   : > { %1353 = vmatpush.msrb.mxu2 %v5988_v25  ;;  %1400 = vmatpush.msrb.mxu3 %v4648_v55  ;;  %v3660_v25 = vld [vmem:[%s4247_s16 + $0x128] sm:$0xff] }
 0x118   : > { %1244 = vmatpush.msrb.mxu0 %v4651_v56  ;;  %1298 = vmatpush.msrb.mxu1 %v4681_v61  ;;  %v4861_v55 = vsub.f32 %v3669_v26, %v4854_v34 }
 0x119   : > { %1357 = vmatpush.msrb.mxu2 %v5989_v35  ;;  %1402 = vmatpush.msrb.mxu3 %v4658_v15  ;;  %v3667_v15 = vld [vmem:[%s4247_s16 + $0x160] sm:$0xff] }
 0x11a   : > { %1247 = vmatpush.msrb.mxu0 %v4661_v20  ;;  %1300 = vmatpush.msrb.mxu1 %v4692_v42  ;;  %v4876_v57 = vand.u32 4294901760, %v3667_v15 }
 0x11b   : > { %1361 = vmatpush.msrb.mxu2 %v5990_v38  ;;  %1404 = vmatpush.msrb.mxu3 %v4667_v41  ;;  %v1637_v41 = vand.u32 4294901760, %v4861_v55  ;;  %v4962_v38 = vand.u32 4294901760, %v3660_v25 }
 0x11c   : > { %1250 = vmatpush.msrb.mxu0 %v4670_v45  ;;  %1302 = vmatpush.msrb.mxu1 %v4702_v62 }
 0x11d   : > { %1365 = vmatpush.msrb.mxu2 %v5991_v44  ;;  %1406 = vmatpush.msrb.mxu3 %v4681_v61  ;;  %v3666_v61 = vld [vmem:[%s4247_s16 + $0x158] sm:$0xff]  ;;  %v1638_v39 = vsub.f32 %v4861_v55, %v1637_v41  ;;  %v4967_v44 = vsub.f32 %v3661_v16, %v4954_v18 }
 0x11e   : > { %1253 = vmatpush.msrb.mxu0 %v4684_v5  ;;  %1304 = vmatpush.msrb.mxu1 %v4711_v40 }
 0x11f   : > { %1369 = vmatpush.msrb.mxu2 %v5992_v48  ;;  %1408 = vmatpush.msrb.mxu3 %v4692_v42 }
 0x120   : > { %1256 = vmatpush.msrb.mxu0 %v4695_v43  ;;  %1306 = vmatpush.msrb.mxu1 %v4725_v29  ;;  %v4887_v43 = vsub.f32 %v3667_v15, %v4876_v57 }
 0x121   : > { %1373 = vmatpush.msrb.mxu2 %v5993_v58  ;;  %1410 = vmatpush.msrb.mxu3 %v4702_v62  ;;  %v4891_v62 = vand.u32 4294901760, %v3666_v61 }
 0x122   : > { %1310 = vmatmul.f32.vlgmr.msrb.gmra.mxu1 %v1113_v36  ;;  %1259 = vmatpush.msrb.mxu0 %v4705_v1  ;;  %v3665_v1 = vld [vmem:[%s4247_s16 + $0x150] sm:$0xff]  ;;  %v1649_v0 = vand.u32 4294901760, %v4887_v43 }
 0x123   : > { %1377 = vmatpush.msrb.mxu2 %v5994_v60  ;;  %1412 = vmatpush.msrb.mxu3 %v4711_v40  ;;  %v1639_v40 = vand.u32 4294901760, %v1638_v39 }
 0x124   : > { %1379 = vmatmul.f32.vlgmr.msrb.gmra.mxu2 %v4745_v14  ;;  %1262 = vmatpush.msrb.mxu0 %v4714_v50  ;;  %v1650_v49 = vsub.f32 %v4887_v43, %v1649_v0 }
 0x125   : > { %1414 = vmatpush.msrb.mxu3 %v4725_v29  ;;  %1494 = vmatpush.msra.mxu2 %v4280_v12  ;;  %v1446_v12 = vand.u32 4294901760, %v1445_v4  ;;  %v4899_v29 = vand.u32 4294901760, %v3665_v1  ;;  %v3658_v4 = vld [vmem:[%s4247_s16 + $0x118] sm:$0xff] }
 0x126   : > { %1416 = vmatmul.f32.vlgmr.msrb.gmra.mxu3 %v4745_v14  ;;  %1265 = vmatpush.msrb.mxu0 %v4728_v46  ;;  %v4903_v46 = vsub.f32 %v3666_v61, %v4891_v62  ;;  %v1651_v32 = vand.u32 4294901760, %v1650_v49  ;;  %v4924_v14 = vand.u32 4294901760, %v3663_v31 }
 0x127   : > { %1517 = vmatpush.msra.mxu3 %v4266_v3  ;;  %1471 = vmatpush.msra.mxu1 %v4318_v30  ;;  %v3670_v30 = vld [vmem:[%s4247_s16 + $0x178] sm:$0xff]  ;;  %v4912_v27 = vsub.f32 %v3665_v1, %v4899_v29 }
 0x128   : > { %1268 = vmatpush.msrb.mxu0 %v4736_v19  ;;  %v4848_v8 = vand.u32 4294901760, %v3670_v30  ;;  %v1655_v52 = vand.u32 4294901760, %v4903_v46  ;;  %v4938_v36 = vsub.f32 %v3663_v31, %v4924_v14 }
 0x129   : > { %1565 = vmatpush.msrb.mxu1 %v4266_v3  ;;  %1271 = vmatmul.f32.vlgmr.msrb.gmra.mxu0 %v4748_v51  ;;  %v1661_v53 = vand.u32 4294901760, %v4912_v27  ;;  %v3662_v51 = vld [vmem:[%s4247_s16 + $0x138] sm:$0xff] }
 0x12a   : > { %1441 = vmatpush.msra.mxu0 %v4266_v3  ;;  %1473 = vmatmul.f32.vlgmr.msra.gmra.mxu1 %v1442_v47  ;;  %v4852_v9 = vsub.f32 %v3670_v30, %v4848_v8  ;;  %v3668_v3 = vld [vmem:[%s4247_s16 + $0x168] sm:$0xff]  ;;  %v1656_v24 = vsub.f32 %v4903_v46, %v1655_v52  ;;  %v4940_v11 = vand.u32 4294901760, %v3662_v51  ;;  %v1673_v6 = vand.u32 4294901760, %v4938_v36 }
 0x12b   : > { %1589 = vmatpush.msrb.mxu2 %v4848_v8  ;;  %1785 = vmatpush.msra.mxu1 %v4848_v8  ;;  %v4863_v56 = vand.u32 4294901760, %v3668_v3  ;;  %v1662_v63 = vsub.f32 %v4912_v27, %v1661_v53 }
 0x12c   : > { %1543 = vmatpush.msrb.mxu0 %v4293_v17  ;;  %1497 = vmatmul.f32.vlgmr.msra.gmra.mxu2 %v1443_v59  ;;  %v1631_v17 = vand.u32 4294901760, %v4852_v9  ;;  %v1657_v33 = vand.u32 4294901760, %v1656_v24  ;;  %v4951_v10 = vsub.f32 %v3662_v51, %v4940_v11  ;;  %v1674_v35 = vsub.f32 %v4938_v36, %v1673_v6  ;;  %v3655_v24 = vld [vmem:[%s4247_s16 + $0x100] sm:$0xff] }
 0x12d   : > { %1591 = vmatpush.msrb.mxu2 %v4854_v34  ;;  %1787 = vmatpush.msra.mxu1 %v4854_v34  ;;  %v4874_v45 = vsub.f32 %v3668_v3, %v4863_v56  ;;  %v1663_v21 = vand.u32 4294901760, %v1662_v63  ;;  %v4975_v59 = vsub.f32 %v3660_v25, %v4962_v38  ;;  %v4988_v3 = vand.u32 4294901760, %v3658_v4 }
 0x12e   : > { %1521 = vmatmul.f32.vlgmr.msra.gmra.mxu3 %v1444_v2  ;;  %v1632_v20 = vsub.f32 %v4852_v9, %v1631_v17  ;;  %v1679_v37 = vand.u32 4294901760, %v4951_v10  ;;  %v1675_v48 = vand.u32 4294901760, %v1674_v35  ;;  %v1685_v2 = vand.u32 4294901760, %v4967_v44 }
 0x12f   : > { %1593 = vmatpush.msrb.mxu2 %v4863_v56  ;;  %1789 = vmatpush.msra.mxu1 %v4863_v56  ;;  %v1643_v42 = vand.u32 4294901760, %v4874_v45  ;;  %v1691_v30 = vand.u32 4294901760, %v4975_v59  ;;  %v5002_v39 = vsub.f32 %v3658_v4, %v4988_v3  ;;  %v5027_v16 = vand.u32 4294901760, %v3655_v24 }
 0x130   : > { %v1633_v5 = vand.u32 4294901760, %v1632_v20  ;;  %v1680_v58 = vsub.f32 %v4951_v10, %v1679_v37  ;;  %v1686_v15 = vsub.f32 %v4967_v44, %v1685_v2  ;;  %v3657_v20 = vld [vmem:[%s4247_s16 + $0x110] sm:$0xff] }
 0x131   : > { %1447 = vmatmul.f32.vlgmr.msra.gmra.mxu0 %v1446_v12  ;;  %1595 = vmatpush.msrb.mxu2 %v4876_v57  ;;  %v1644_v50 = vsub.f32 %v4874_v45, %v1643_v42  ;;  %v1692_v61 = vsub.f32 %v4975_v59, %v1691_v30  ;;  %v5004_v1 = vand.u32 4294901760, %v3657_v20  ;;  %v1703_v49 = vand.u32 4294901760, %v5002_v39 }
 0x132   : > { %1567 = vmatmul.f32.vlgmr.msrb.gmra.mxu1 %v1442_v47  ;;  %1732 = vmatpush.msra.mxu0 %v4852_v9  ;;  %v1681_v12 = vand.u32 4294901760, %v1680_v58 }
 0x133   : > { %1791 = vmatpush.msra.mxu1 %v4876_v57  ;;  %1634 = vmatpush.msrb.mxu3 %v1633_v5  ;;  %v1645_v19 = vand.u32 4294901760, %v1644_v50  ;;  %v3656_v50 = vld [vmem:[%s4247_s16 + $0x108] sm:$0xff]  ;;  %v1693_v13 = vand.u32 4294901760, %v1692_v61  ;;  %v5015_v31 = vsub.f32 %v3657_v20, %v5004_v1  ;;  %v1704_v63 = vsub.f32 %v5002_v39, %v1703_v49 }
 0x134   : > { %1735 = vmatpush.msra.mxu0 %v4861_v55  ;;  %1597 = vmatpush.msrb.mxu2 %v4891_v62 }
 0x135   : > { %1793 = vmatpush.msra.mxu1 %v4891_v62  ;;  %1640 = vmatpush.msrb.mxu3 %v1639_v40  ;;  %v1687_v40 = vand.u32 4294901760, %v1686_v15  ;;  %v1705_v23 = vand.u32 4294901760, %v1704_v63 }
 0x136   : > { %1738 = vmatpush.msra.mxu0 %v4874_v45  ;;  %1599 = vmatpush.msrb.mxu2 %v4899_v29 }
 0x137   : > { %1646 = vmatpush.msrb.mxu3 %v1645_v19  ;;  %1795 = vmatpush.msra.mxu1 %v4899_v29 }
 0x138   : > { %1741 = vmatpush.msra.mxu0 %v4887_v43  ;;  %1601 = vmatpush.msrb.mxu2 %v4914_v22 }
 0x139   : > { %1545 = vmatmul.f32.vlgmr.msrb.gmra.mxu0 %v1442_v47  ;;  %1652 = vmatpush.msrb.mxu3 %v1651_v32  ;;  %v3659_v47 = vld [vmem:[%s4247_s16 + $0x120] sm:$0xff]  ;;  %v5019_v32 = vand.u32 4294901760, %v3656_v50 }
 0x13a   : > { %1744 = vmatpush.msra.mxu0 %v4903_v46  ;;  %1797 = vmatpush.msra.mxu1 %v4914_v22  ;;  %v4977_v60 = vand.u32 4294901760, %v3659_v47 }
 0x13b   : > { %1603 = vmatpush.msrb.mxu2 %v4924_v14  ;;  %1658 = vmatpush.msrb.mxu3 %v1657_v33  ;;  %v1709_v33 = vand.u32 4294901760, %v5015_v31 }
 0x13c   : > { %1747 = vmatpush.msra.mxu0 %v4912_v27  ;;  %1799 = vmatpush.msra.mxu1 %v4924_v14  ;;  %v4986_v26 = vsub.f32 %v3659_v47, %v4977_v60 }
 0x13d   : > { %1605 = vmatpush.msrb.mxu2 %v4940_v11  ;;  %1664 = vmatpush.msrb.mxu3 %v1663_v21  ;;  %v5032_v21 = vsub.f32 %v3656_v50, %v5019_v32  ;;  %v1710_v25 = vsub.f32 %v5015_v31, %v1709_v33 }
 0x13e   : > { %1750 = vmatpush.msra.mxu0 %v4922_v54  ;;  %1801 = vmatpush.msra.mxu1 %v4940_v11  ;;  %v1697_v5 = vand.u32 4294901760, %v4986_v26 }
 0x13f   : > { %1607 = vmatpush.msrb.mxu2 %v4954_v18  ;;  %1670 = vmatpush.msrb.mxu3 %v1669_v28  ;;  %v1720_v28 = vsub.f32 %v3655_v24, %v5027_v16  ;;  %v1715_v35 = vand.u32 4294901760, %v5032_v21  ;;  %v1711_v47 = vand.u32 4294901760, %v1710_v25 }
 0x140   : > { %1753 = vmatpush.msra.mxu0 %v4938_v36  ;;  %1803 = vmatpush.msra.mxu1 %v4954_v18  ;;  %v1698_v19 = vsub.f32 %v4986_v26, %v1697_v5  ;;  %v1946_v36 = vld [vmem:[#allocation10 + $0x68] sm:$0xff] }
 0x141   : > { %1609 = vmatpush.msrb.mxu2 %v4962_v38  ;;  %1676 = vmatpush.msrb.mxu3 %v1675_v48  ;;  %v1721_v48 = vand.u32 4294901760, %v1720_v28  ;;  %v1716_v58 = vsub.f32 %v5032_v21, %v1715_v35 }
 0x142   : > { %1756 = vmatpush.msra.mxu0 %v4951_v10  ;;  %1805 = vmatpush.msra.mxu1 %v4962_v38  ;;  %v1699_v51 = vand.u32 4294901760, %v1698_v19 }
 0x143   : > { %1611 = vmatpush.msrb.mxu2 %v4977_v60  ;;  %1682 = vmatpush.msrb.mxu3 %v1681_v12  ;;  %v1722_v4 = vsub.f32 %v1720_v28, %v1721_v48  ;;  %v1717_v12 = vand.u32 4294901760, %v1716_v58 }
 0x144   : > { %1759 = vmatpush.msra.mxu0 %v4967_v44  ;;  %1807 = vmatpush.msra.mxu1 %v4977_v60  ;;  %v1943_v44 = vld [vmem:[#allocation10 + $0x50] sm:$0xff] }
 0x145   : > { %1613 = vmatpush.msrb.mxu2 %v4988_v3  ;;  %1688 = vmatpush.msrb.mxu3 %v1687_v40  ;;  %v1723_v61 = vand.u32 4294901760, %v1722_v4  ;;  %v1940_v4 = vld [vmem:[#allocation10 + $0x38] sm:$0xff] }
 0x146   : > { %1762 = vmatpush.msra.mxu0 %v4975_v59  ;;  %1809 = vmatpush.msra.mxu1 %v4988_v3 }
 0x147   : > { %1615 = vmatpush.msrb.mxu2 %v5004_v1  ;;  %1694 = vmatpush.msrb.mxu3 %v1693_v13 }
 0x148   : > { %1765 = vmatpush.msra.mxu0 %v4986_v26  ;;  %1811 = vmatpush.msra.mxu1 %v5004_v1  ;;  %v5102_v26 = vand.u32 4294901760, %v1943_v44 }
 0x149   : > { %1617 = vmatpush.msrb.mxu2 %v5019_v32  ;;  %1700 = vmatpush.msrb.mxu3 %v1699_v51 }
 0x14a   : > { %1768 = vmatpush.msra.mxu0 %v5002_v39  ;;  %1813 = vmatpush.msra.mxu1 %v5019_v32 }
 0x14b   : > { %1619 = vmatpush.msrb.mxu2 %v5027_v16  ;;  %1706 = vmatpush.msrb.mxu3 %v1705_v23 }
 0x14c   : > { %1771 = vmatpush.msra.mxu0 %v5015_v31  ;;  %1815 = vmatpush.msra.mxu1 %v5027_v16 }
 0x14d   : > { %1826 = vmatpush.msra.mxu2 %v1631_v17  ;;  %1712 = vmatpush.msrb.mxu3 %v1711_v47 }
 0x14e   : > { %1774 = vmatpush.msra.mxu0 %v5032_v21 }
 0x14f   : > { %1830 = vmatpush.msra.mxu2 %v1637_v41  ;;  %1718 = vmatpush.msrb.mxu3 %v1717_v12  ;;  %v1939_v12 = vld [vmem:[#allocation10 + $0x30] sm:$0xff] }
 0x150   : > { %1777 = vmatpush.msra.mxu0 %v1720_v28 }
 0x151   : > { %1834 = vmatpush.msra.mxu2 %v1643_v42  ;;  %1724 = vmatpush.msrb.mxu3 %v1723_v61 }
 0x153   : > { %1838 = vmatpush.msra.mxu2 %v1649_v0  ;;  %1893 = vmatpush.msra.mxu3 %v4848_v8 }
 0x155   : > { %1842 = vmatpush.msra.mxu2 %v1655_v52  ;;  %1895 = vmatpush.msra.mxu3 %v4854_v34 }
 0x157   : > { %1846 = vmatpush.msra.mxu2 %v1661_v53  ;;  %1897 = vmatpush.msra.mxu3 %v4863_v56 }
 0x159   : > { %1850 = vmatpush.msra.mxu2 %v1667_v7  ;;  %1899 = vmatpush.msra.mxu3 %v4876_v57  ;;  %v1947_v7 = vld [vmem:[#allocation10 + $0x70] sm:$0xff] }
 0x15a   : > { %v5094_v10 = vand.u32 4294901760, %v1947_v7 }
 0x15b   : > { %1854 = vmatpush.msra.mxu2 %v1673_v6  ;;  %1901 = vmatpush.msra.mxu3 %v4891_v62 }
 0x15c   : > { %v5108_v39 = vsub.f32 %v1947_v7, %v5094_v10 }
 0x15d   : > { %1858 = vmatpush.msra.mxu2 %v1679_v37  ;;  %1903 = vmatpush.msra.mxu3 %v4899_v29  ;;  %v1945_v37 = vld [vmem:[#allocation10 + $0x60] sm:$0xff] }
 0x15e   : > { %v1998_v51 = vand.u32 4294901760, %v5108_v39 }
 0x15f   : > { %1862 = vmatpush.msra.mxu2 %v1685_v2  ;;  %1905 = vmatpush.msra.mxu3 %v4914_v22  ;;  %v5098_v2 = vand.u32 4294901760, %v1945_v37 }
 0x161   : > { %1866 = vmatpush.msra.mxu2 %v1691_v30  ;;  %1907 = vmatpush.msra.mxu3 %v4924_v14  ;;  %v1948_v14 = vld [vmem:[#allocation10 + $0x78] sm:$0xff] }
 0x162   : > { %v5092_v6 = vand.u32 4294901760, %v1948_v14 }
 0x163   : > { %1870 = vmatpush.msra.mxu2 %v1697_v5  ;;  %1909 = vmatpush.msra.mxu3 %v4940_v11 }
 0x164   : > { %v5105_v5 = vsub.f32 %v1948_v14, %v5092_v6  ;;  %1950 = vmatpush.msrb.mxu0 %v5092_v6 }
 0x165   : > { %1874 = vmatpush.msra.mxu2 %v1703_v49  ;;  %1911 = vmatpush.msra.mxu3 %v4954_v18  ;;  %v5096_v18 = vand.u32 4294901760, %v1946_v36  ;;  %v5117_v49 = vsub.f32 %v1945_v37, %v5098_v2  ;;  %v1935_v37 = vld [vmem:[#allocation10 + $0x10] sm:$0xff] }
 0x166   : > { %v1992_v24 = vand.u32 4294901760, %v5105_v5  ;;  %1952 = vmatpush.msrb.mxu0 %v5094_v10 }
 0x167   : > { %1878 = vmatpush.msra.mxu2 %v1709_v33  ;;  %1913 = vmatpush.msra.mxu3 %v4962_v38  ;;  %v1944_v38 = vld [vmem:[#allocation10 + $0x58] sm:$0xff]  ;;  %v5127_v33 = vsub.f32 %v1943_v44, %v5102_v26  ;;  %v2010_v21 = vand.u32 4294901760, %v5117_v49 }
 0x168   : > { %v5100_v30 = vand.u32 4294901760, %v1944_v38  ;;  %v1993_v28 = vsub.f32 %v5105_v5, %v1992_v24  ;;  %1954 = vmatpush.msrb.mxu0 %v5096_v18 }
 0x169   : > { %1882 = vmatpush.msra.mxu2 %v1715_v35  ;;  %1915 = vmatpush.msra.mxu3 %v4977_v60  ;;  %v1999_v35 = vsub.f32 %v5108_v39, %v1998_v51 }
 0x16a   : > { %v5120_v31 = vsub.f32 %v1944_v38, %v5100_v30  ;;  %v1994_v61 = vand.u32 4294901760, %v1993_v28  ;;  %1956 = vmatpush.msrb.mxu0 %v5098_v2 }
 0x16b   : > { %1886 = vmatpush.msra.mxu2 %v1721_v48  ;;  %1917 = vmatpush.msra.mxu3 %v4988_v3  ;;  %v1942_v3 = vld [vmem:[#allocation10 + $0x48] sm:$0xff] }
 0x16c   : > { %v5114_v13 = vand.u32 4294901760, %v1942_v3  ;;  %v2016_v23 = vand.u32 4294901760, %v5120_v31  ;;  %1995 = vmatpush.msrb.mxu1 %v1994_v61  ;;  %1958 = vmatpush.msrb.mxu0 %v5100_v30 }
 0x16d   : > { %1919 = vmatpush.msra.mxu3 %v5004_v1  ;;  %v5111_v1 = vsub.f32 %v1946_v36, %v5096_v18 }
 0x16e   : > { %v5132_v25 = vsub.f32 %v1942_v3, %v5114_v13  ;;  %1960 = vmatpush.msrb.mxu0 %v5102_v26 }
 0x16f   : > { %1921 = vmatpush.msra.mxu3 %v5019_v32  ;;  %v2004_v63 = vand.u32 4294901760, %v5111_v1 }
 0x170   : > { %1962 = vmatpush.msrb.mxu0 %v5114_v13 }
 0x171   : > { %1923 = vmatpush.msra.mxu3 %v5027_v16  ;;  %v1941_v16 = vld [vmem:[#allocation10 + $0x40] sm:$0xff]  ;;  %v2005_v47 = vsub.f32 %v5111_v1, %v2004_v63 }
 0x172   : > { %v5144_v58 = vand.u32 4294901760, %v1941_v16 }
 0x174   : > { %1964 = vmatpush.msrb.mxu0 %v5144_v58 }
 0x17c   : > { %v877_v15 = vpop.f32.mrf.mxu1 }
 0x184   : > { %v776_v20 = vpop.f32.mrf.mxu0  ;;  %v931_v17 = vpop.f32.mrf.mxu2 }
 0x185   : > { %v878_v9 = vadd.f32 %v877_v15, %v776_v20  ;;  %v1076_v45 = vpop.f32.mrf.mxu1 }
 0x186   : > { %v970_v50 = vpop.f32.mrf.mxu3 }
 0x187   : > { %v932_v40 = vadd.f32 %v931_v17, %v878_v9  ;;  %v2000_v9 = vand.u32 4294901760, %v1999_v35  ;;  %v2011_v17 = vsub.f32 %v5117_v49, %v2010_v21  ;;  %v5200_v35 = vand.u32 4294901760, %v1935_v37 }
 0x189   : > { %v971_v55 = vadd.f32 %v970_v50, %v932_v40  ;;  %v2022_v40 = vand.u32 4294901760, %v5127_v33  ;;  %v1938_v50 = vld [vmem:[#allocation10 + $0x28] sm:$0xff]  ;;  %2001 = vmatpush.msrb.mxu1 %v2000_v9 }
 0x18d   : > { %v1117_v42 = vpop.f32.mrf.mxu2 }
 0x18e   : > { %v1039_v41 = vpop.f32.mrf.mxu0 }
 0x18f   : > { %v1040_v8 = vadd.f32 %v1039_v41, %v971_v55  ;;  %v2017_v41 = vsub.f32 %v5120_v31, %v2016_v23 }
 0x190   : > { %v1218_v43 = vpop.f32.mrf.mxu3 }
 0x191   : > { %v1077_v34 = vadd.f32 %v1076_v45, %v1040_v8  ;;  %v2028_v8 = vand.u32 4294901760, %v5132_v25  ;;  %v2006_v45 = vand.u32 4294901760, %v2005_v47  ;;  %v2018_v7 = vand.u32 4294901760, %v2017_v41 }
 0x193   : > { %v1118_v56 = vadd.f32 %v1117_v42, %v1077_v34  ;;  %v5156_v34 = vsub.f32 %v1941_v16, %v5144_v58  ;;  %v5159_v42 = vand.u32 4294901760, %v1940_v4  ;;  %2007 = vmatpush.msrb.mxu1 %v2006_v45  ;;  %v2029_v36 = vsub.f32 %v5132_v25, %v2028_v8 }
 0x195   : > { %v1219_v57 = vadd.f32 %v1218_v43, %v1118_v56  ;;  %v5161_v56 = vand.u32 4294901760, %v1939_v12  ;;  %v1937_v43 = vld [vmem:[#allocation10 + $0x20] sm:$0xff]  ;;  %v2030_v47 = vand.u32 4294901760, %v2029_v36  ;;  %1966 = vmatpush.msrb.mxu0 %v5159_v42 }
 0x197   : > { %v5178_v14 = vsub.f32 %v1939_v12, %v5161_v56  ;;  %1968 = vmatpush.msrb.mxu0 %v5161_v56 }
 0x199   : > { %v2046_v28 = vand.u32 4294901760, %v5178_v14 }
 0x19f   : > { %v1311_v62 = vpop.f32.mrf.mxu1 }
 0x1a6   : > { %v1272_v0 = vpop.f32.mrf.mxu0 }
 0x1a7   : > { %v1273_v29 = vadd.f32 %v1272_v0, %v1219_v57  ;;  %v1380_v46 = vpop.f32.mrf.mxu2  ;;  %v1474_v53 = vpop.f32.mrf.mxu1  ;;  %v2012_v0 = vand.u32 4294901760, %v2011_v17 }
 0x1a9   : > { %v1312_v27 = vadd.f32 %v1311_v62, %v1273_v29  ;;  %v1417_v22 = vpop.f32.mrf.mxu3  ;;  %v5163_v62 = vand.u32 4294901760, %v1938_v50  ;;  %v2023_v29 = vsub.f32 %v5127_v33, %v2022_v40  ;;  %2013 = vmatpush.msrb.mxu1 %v2012_v0 }
 0x1ab   : > { %v1381_v52 = vadd.f32 %v1380_v46, %v1312_v27  ;;  %v5169_v46 = vsub.f32 %v1940_v4, %v5159_v42  ;;  %v5172_v27 = vand.u32 4294901760, %v1937_v43  ;;  %2019 = vmatpush.msrb.mxu1 %v2018_v7  ;;  %1970 = vmatpush.msrb.mxu0 %v5163_v62 }
 0x1ad   : > { %v5090_v54 = vadd.f32 %v1417_v22, %v1381_v52  ;;  %v1936_v22 = vld [vmem:[#allocation10 + $0x18] sm:$0xff]  ;;  %v2040_v44 = vand.u32 4294901760, %v5169_v46  ;;  %v5194_v3 = vsub.f32 %v1937_v43, %v5172_v27  ;;  %1972 = vmatpush.msrb.mxu0 %v5172_v27 }
 0x1ae   : > { %v1448_v11 = vpop.f32.mrf.mxu0 }
 0x1af   : > { %v1475_v59 = vadd.f32 %v1474_v53, %v1448_v11  ;;  %v1498_v60 = vpop.f32.mrf.mxu2  ;;  %v1568_v20 = vpop.f32.mrf.mxu1  ;;  %v2034_v53 = vand.u32 4294901760, %v5156_v34  ;;  %v5185_v11 = vsub.f32 %v1938_v50, %v5163_v62  ;;  %v2041_v12 = vsub.f32 %v5169_v46, %v2040_v44 }
 0x1b0   : > { %v2058_v61 = vand.u32 4294901760, %v5194_v3  ;;  %v2047_v50 = vsub.f32 %v5178_v14, %v2046_v28 }
 0x1b1   : > { %v1499_v19 = vadd.f32 %v1498_v60, %v1475_v59  ;;  %v1522_v32 = vpop.f32.mrf.mxu3  ;;  %v5190_v59 = vand.u32 4294901760, %v1936_v22  ;;  %v2024_v60 = vand.u32 4294901760, %v2023_v29  ;;  %v2035_v16 = vsub.f32 %v5156_v34, %v2034_v53 }
 0x1b2   : > { %v2042_v41 = vand.u32 4294901760, %v2041_v12  ;;  %v2048_v0 = vand.u32 4294901760, %v2047_v50  ;;  %v2059_v29 = vsub.f32 %v5194_v3, %v2058_v61 }
 0x1b3   : > { %v1523_v48 = vadd.f32 %v1522_v32, %v1499_v19  ;;  %v1934_v19 = vld [vmem:[#allocation10 + $0x8] sm:$0xff]  ;;  %2025 = vmatpush.msrb.mxu1 %v2024_v60  ;;  %v2036_v17 = vand.u32 4294901760, %v2035_v16  ;;  %1974 = vmatpush.msrb.mxu0 %v5190_v59 }
 0x1b5   : > { %2031 = vmatpush.msrb.mxu1 %v2030_v47  ;;  %1976 = vmatpush.msrb.mxu0 %v5200_v35  ;;  %v1933_v47 = vld [vmem:[#allocation10] sm:$0xff] }
 0x1b6   : > { %v1546_v15 = vpop.f32.mrf.mxu0 }
 0x1b7   : > { %v1547_v55 = vadd.f32 %v1546_v15, %v1523_v48  ;;  %v2052_v48 = vand.u32 4294901760, %v5185_v11  ;;  %v5209_v15 = vsub.f32 %v1936_v22, %v5190_v59  ;;  %2037 = vmatpush.msrb.mxu1 %v2036_v17  ;;  %v2307_v17 = vld [vmem:[#allocation10 + $0xf8] sm:$0xff] }
 0x1b8   : > { %v5289_v50 = vand.u32 4294901760, %v2307_v17 }
 0x1b9   : > { %v1569_v57 = vadd.f32 %v1568_v20, %v1547_v55  ;;  %v5211_v20 = vand.u32 4294901760, %v1934_v19  ;;  %v5220_v55 = vsub.f32 %v1935_v37, %v5200_v35  ;;  %v2053_v45 = vsub.f32 %v5185_v11, %v2052_v48  ;;  %2043 = vmatpush.msrb.mxu1 %v2042_v41 }
 0x1ba   : > { %v2064_v43 = vand.u32 4294901760, %v5209_v15 }
 0x1bb   : > { %v5174_v52 = vand.u32 4294901760, %v1569_v57  ;;  %v2070_v22 = vand.u32 4294901760, %v5220_v55  ;;  %v2054_v7 = vand.u32 4294901760, %v2053_v45  ;;  %2049 = vmatpush.msrb.mxu1 %v2048_v0  ;;  %1978 = vmatpush.msrb.mxu0 %v5211_v20  ;;  %v2306_v45 = vld [vmem:[#allocation10 + $0xf0] sm:$0xff] }
 0x1bc   : > { %v2065_v36 = vsub.f32 %v5209_v15, %v2064_v43 }
 0x1bd   : > { %v1621_v38 = vsub.f32 %v1569_v57, %v5174_v52  ;;  %1726 = vmatmul.f32.vlgmr.msrb.gmra.mxu3 %v5174_v52  ;;  %v5229_v57 = vsub.f32 %v1934_v19, %v5211_v20  ;;  %v2071_v60 = vsub.f32 %v5220_v55, %v2070_v22  ;;  %2055 = vmatpush.msrb.mxu1 %v2054_v7 }
 0x1be   : > { %2146 = vmatpush.msrb.mxu3 %v5092_v6  ;;  %v2066_v19 = vand.u32 4294901760, %v2065_v36  ;;  %v2304_v36 = vld [vmem:[#allocation10 + $0xe0] sm:$0xff] }
 0x1bf   : > { %v1622_v32 = vand.u32 4294901760, %v1621_v38  ;;  %1780 = vmatmul.f32.vlgmr.msra.gmra.mxu0 %v1621_v38  ;;  %v2076_v37 = vand.u32 4294901760, %v5229_v57  ;;  %v2072_v16 = vand.u32 4294901760, %v2071_v60 }
 0x1c0   : > { %2148 = vmatpush.msrb.mxu3 %v5094_v10 }
 0x1c1   : > { %v1623_v4 = vsub.f32 %v1621_v38, %v1622_v32  ;;  %1819 = vmatmul.f32.vlgmr.msra.gmra.mxu1 %v1622_v32  ;;  %v2060_v38 = vand.u32 4294901760, %v2059_v29  ;;  %v2077_v32 = vsub.f32 %v5229_v57, %v2076_v37  ;;  %v2305_v29 = vld [vmem:[#allocation10 + $0xe8] sm:$0xff] }
 0x1c2   : > { %2150 = vmatpush.msrb.mxu3 %v5096_v18 }
 0x1c3   : > { %v1624_v9 = vand.u32 4294901760, %v1623_v4  ;;  %2061 = vmatpush.msrb.mxu1 %v2060_v38  ;;  %v5278_v4 = vand.u32 4294901760, %v1933_v47  ;;  %v5319_v38 = vand.u32 4294901760, %v2304_v36 }
 0x1c4   : > { %2152 = vmatpush.msrb.mxu3 %v5098_v2 }
 0x1c5   : > { %1625 = vmatmul.f32.vlgmr.msrb.gmra.mxu2 %v1624_v9  ;;  %1925 = vmatmul.f32.vlgmr.msra.gmra.mxu3 %v5174_v52  ;;  %v5281_v12 = vsub.f32 %v1933_v47, %v5278_v4 }
 0x1c6   : > { %2093 = vmatpush.msrb.mxu2 %v5105_v5  ;;  %2154 = vmatpush.msrb.mxu3 %v5100_v30  ;;  %v5298_v5 = vsub.f32 %v2307_v17, %v5289_v50 }
 0x1c7   : > { %2067 = vmatpush.msrb.mxu1 %v2066_v19  ;;  %1980 = vmatpush.msrb.mxu0 %v5278_v4  ;;  %v2082_v9 = vand.u32 4294901760, %v5281_v12  ;;  %v2303_v19 = vld [vmem:[#allocation10 + $0xd8] sm:$0xff] }
 0x1c8   : > { %2096 = vmatpush.msrb.mxu2 %v5108_v39  ;;  %2156 = vmatpush.msrb.mxu3 %v5102_v26  ;;  %v2351_v39 = vand.u32 4294901760, %v5298_v5 }
 0x1c9   : > { %2073 = vmatpush.msrb.mxu1 %v2072_v16  ;;  %2187 = vmatpush.msra.mxu0 %v1992_v24  ;;  %v2083_v41 = vsub.f32 %v5281_v12, %v2082_v9  ;;  %v5300_v24 = vand.u32 4294901760, %v2306_v45  ;;  %v5335_v16 = vsub.f32 %v2304_v36, %v5319_v38 }
 0x1ca   : > { %2099 = vmatpush.msrb.mxu2 %v5111_v1  ;;  %2158 = vmatpush.msrb.mxu3 %v5114_v13  ;;  %v2352_v1 = vsub.f32 %v5298_v5, %v2351_v39 }
 0x1cb   : > { %2191 = vmatpush.msra.mxu0 %v1998_v51  ;;  %v2084_v0 = vand.u32 4294901760, %v2083_v41  ;;  %v5306_v51 = vand.u32 4294901760, %v2305_v29  ;;  %v5309_v7 = vsub.f32 %v2306_v45, %v5300_v24  ;;  %v2369_v17 = vand.u32 4294901760, %v5335_v16  ;;  %v2301_v41 = vld [vmem:[#allocation10 + $0xc8] sm:$0xff] }
 0x1cc   : > { %2102 = vmatpush.msrb.mxu2 %v5117_v49  ;;  %2160 = vmatpush.msrb.mxu3 %v5144_v58 }
 0x1cd   : > { %1888 = vmatmul.f32.vlgmr.msra.gmra.mxu2 %v5174_v52  ;;  %v2078_v52 = vand.u32 4294901760, %v2077_v32  ;;  %2195 = vmatpush.msra.mxu0 %v2004_v63  ;;  %v2357_v63 = vand.u32 4294901760, %v5309_v7  ;;  %v5322_v60 = vsub.f32 %v2305_v29, %v5306_v51  ;;  %v5332_v32 = vand.u32 4294901760, %v2303_v19  ;;  %v2300_v29 = vld [vmem:[#allocation10 + $0xc0] sm:$0xff] }
 0x1ce   : > { %2105 = vmatpush.msrb.mxu2 %v5120_v31  ;;  %2162 = vmatpush.msrb.mxu3 %v5159_v42 }
 0x1cf   : > { %2079 = vmatpush.msrb.mxu1 %v2078_v52  ;;  %2199 = vmatpush.msra.mxu0 %v2010_v21  ;;  %v2358_v49 = vsub.f32 %v5309_v7, %v2357_v63  ;;  %v2363_v21 = vand.u32 4294901760, %v5322_v60  ;;  %v2302_v52 = vld [vmem:[#allocation10 + $0xd0] sm:$0xff]  ;;  %v5346_v47 = vsub.f32 %v2303_v19, %v5332_v32  ;;  %v2299_v19 = vld [vmem:[#allocation10 + $0xb8] sm:$0xff] }
 0x1d0   : > { %2108 = vmatpush.msrb.mxu2 %v5127_v33  ;;  %2164 = vmatpush.msrb.mxu3 %v5161_v56 }
 0x1d1   : > { %2085 = vmatpush.msrb.mxu1 %v2084_v0  ;;  %2203 = vmatpush.msra.mxu0 %v2016_v23  ;;  %v2364_v31 = vsub.f32 %v5322_v60, %v2363_v21  ;;  %v5343_v23 = vand.u32 4294901760, %v2302_v52  ;;  %v2375_v33 = vand.u32 4294901760, %v5346_v47  ;;  %v2370_v0 = vsub.f32 %v5335_v16, %v2369_v17 }
 0x1d2   : > { %2111 = vmatpush.msrb.mxu2 %v5132_v25  ;;  %2166 = vmatpush.msrb.mxu3 %v5163_v62 }
 0x1d3   : > { %2254 = vmatpush.msra.mxu1 %v5092_v6  ;;  %v2353_v6 = vand.u32 4294901760, %v2352_v1  ;;  %2207 = vmatpush.msra.mxu0 %v2022_v40  ;;  %v5354_v40 = vand.u32 4294901760, %v2301_v41  ;;  %v5357_v45 = vsub.f32 %v2302_v52, %v5343_v23  ;;  %v2371_v1 = vand.u32 4294901760, %v2370_v0  ;;  %v2298_v52 = vld [vmem:[#allocation10 + $0xb0] sm:$0xff] }
 0x1d4   : > { %2114 = vmatpush.msrb.mxu2 %v5156_v34  ;;  %2168 = vmatpush.msrb.mxu3 %v5172_v27 }
 0x1d5   : > { %2256 = vmatpush.msra.mxu1 %v5094_v10  ;;  %v2359_v10 = vand.u32 4294901760, %v2358_v49  ;;  %2211 = vmatpush.msra.mxu0 %v2028_v8  ;;  %v2381_v25 = vand.u32 4294901760, %v5357_v45  ;;  %v5370_v8 = vand.u32 4294901760, %v2300_v29  ;;  %v5373_v36 = vsub.f32 %v2301_v41, %v5354_v40  ;;  %v2297_v41 = vld [vmem:[#allocation10 + $0xa8] sm:$0xff] }
 0x1d6   : > { %2117 = vmatpush.msrb.mxu2 %v5169_v46  ;;  %2170 = vmatpush.msrb.mxu3 %v5190_v59  ;;  %v5404_v0 = vand.u32 4294901760, %v2297_v41 }
 0x1d7   : > { %2258 = vmatpush.msra.mxu1 %v5096_v18  ;;  %v2365_v18 = vand.u32 4294901760, %v2364_v31  ;;  %2215 = vmatpush.msra.mxu0 %v2034_v53  ;;  %v2382_v34 = vsub.f32 %v5357_v45, %v2381_v25  ;;  %v2387_v53 = vand.u32 4294901760, %v5373_v36  ;;  %v5387_v49 = vsub.f32 %v2300_v29, %v5370_v8 }
 0x1d8   : > { %2120 = vmatpush.msrb.mxu2 %v5178_v14  ;;  %2172 = vmatpush.msrb.mxu3 %v5200_v35 }
 0x1d9   : > { %2260 = vmatpush.msra.mxu1 %v5098_v2  ;;  %v2376_v2 = vsub.f32 %v5346_v47, %v2375_v33  ;;  %2219 = vmatpush.msra.mxu0 %v2040_v44  ;;  %v2383_v46 = vand.u32 4294901760, %v2382_v34  ;;  %v5393_v44 = vand.u32 4294901760, %v2298_v52  ;;  %v2393_v31 = vand.u32 4294901760, %v5387_v49 }
 0x1da   : > { %2123 = vmatpush.msrb.mxu2 %v5185_v11  ;;  %2174 = vmatpush.msrb.mxu3 %v5211_v20  ;;  %v5423_v11 = vsub.f32 %v2297_v41, %v5404_v0 }
 0x1db   : > { %2262 = vmatpush.msra.mxu1 %v5100_v30  ;;  %v2377_v30 = vand.u32 4294901760, %v2376_v2  ;;  %2223 = vmatpush.msra.mxu0 %v2046_v28  ;;  %v5407_v29 = vsub.f32 %v2298_v52, %v5393_v44  ;;  %v2394_v14 = vsub.f32 %v5387_v49, %v2393_v31  ;;  %v2296_v28 = vld [vmem:[#allocation10 + $0xa0] sm:$0xff] }
 0x1dc   : > { %2126 = vmatpush.msrb.mxu2 %v5194_v3  ;;  %2176 = vmatpush.msrb.mxu3 %v5278_v4  ;;  %v2411_v34 = vand.u32 4294901760, %v5423_v11 }
 0x1dd   : > { %2264 = vmatpush.msra.mxu1 %v5102_v26  ;;  %v2388_v26 = vsub.f32 %v5373_v36, %v2387_v53  ;;  %2227 = vmatpush.msra.mxu0 %v2052_v48  ;;  %v2405_v2 = vand.u32 4294901760, %v5407_v29  ;;  %v2395_v48 = vand.u32 4294901760, %v2394_v14 }
 0x1de   : > { %2129 = vmatpush.msrb.mxu2 %v5209_v15  ;;  %2354 = vmatpush.msra.mxu3 %v2353_v6  ;;  %v5383_v6 = vand.u32 4294901760, %v2299_v19 }
 0x1df   : > { %2266 = vmatpush.msra.mxu1 %v5114_v13  ;;  %v2389_v13 = vand.u32 4294901760, %v2388_v26  ;;  %2231 = vmatpush.msra.mxu0 %v2058_v61  ;;  %v2294_v61 = vld [vmem:[#allocation10 + $0x90] sm:$0xff] }
 0x1e0   : > { %2132 = vmatpush.msrb.mxu2 %v5220_v55  ;;  %2360 = vmatpush.msra.mxu3 %v2359_v10  ;;  %v5396_v10 = vsub.f32 %v2299_v19, %v5383_v6  ;;  %v2295_v19 = vld [vmem:[#allocation10 + $0x98] sm:$0xff]  ;;  %v5445_v26 = vand.u32 4294901760, %v2294_v61 }
 0x1e1   : > { %2268 = vmatpush.msra.mxu1 %v5144_v58  ;;  %v5433_v52 = vand.u32 4294901760, %v2295_v19  ;;  %2235 = vmatpush.msra.mxu0 %v2064_v43  ;;  %v2293_v43 = vld [vmem:[#allocation10 + $0x88] sm:$0xff] }
 0x1e2   : > { %2135 = vmatpush.msrb.mxu2 %v5229_v57  ;;  %2366 = vmatpush.msra.mxu3 %v2365_v18  ;;  %v2399_v18 = vand.u32 4294901760, %v5396_v10  ;;  %v5456_v14 = vand.u32 4294901760, %v2293_v43 }
 0x1e3   : > { %2270 = vmatpush.msra.mxu1 %v5159_v42  ;;  %v5448_v41 = vsub.f32 %v2295_v19, %v5433_v52  ;;  %2239 = vmatpush.msra.mxu0 %v2070_v22  ;;  %v2292_v22 = vld [vmem:[#allocation10 + $0x80] sm:$0xff] }
 0x1e4   : > { %2138 = vmatpush.msrb.mxu2 %v5281_v12  ;;  %2372 = vmatpush.msra.mxu3 %v2371_v1  ;;  %v2400_v58 = vsub.f32 %v5396_v10, %v2399_v18  ;;  %v5420_v1 = vand.u32 4294901760, %v2296_v28  ;;  %v5475_v57 = vsub.f32 %v2293_v43, %v5456_v14 }
 0x1e5   : > { %2272 = vmatpush.msra.mxu1 %v5161_v56  ;;  %2243 = vmatpush.msra.mxu0 %v2076_v37 }
 0x1e6   : > { %2309 = vmatpush.msra.mxu2 %v5289_v50  ;;  %2378 = vmatpush.msra.mxu3 %v2377_v30  ;;  %v2401_v42 = vand.u32 4294901760, %v2400_v58  ;;  %v2406_v30 = vsub.f32 %v5407_v29, %v2405_v2  ;;  %v5439_v3 = vsub.f32 %v2296_v28, %v5420_v1  ;;  %v5459_v28 = vsub.f32 %v2294_v61, %v5445_v26 }
 0x1e7   : > { %2274 = vmatpush.msra.mxu1 %v5163_v62  ;;  %2247 = vmatpush.msra.mxu0 %v2082_v9 }
 0x1e8   : > { %2311 = vmatpush.msra.mxu2 %v5300_v24  ;;  %2384 = vmatpush.msra.mxu3 %v2383_v46  ;;  %v2407_v56 = vand.u32 4294901760, %v2406_v30  ;;  %v2412_v46 = vsub.f32 %v5423_v11, %v2411_v34  ;;  %v2417_v15 = vand.u32 4294901760, %v5439_v3  ;;  %v2429_v58 = vand.u32 4294901760, %v5459_v28 }
 0x1e9   : > { %2276 = vmatpush.msra.mxu1 %v5172_v27 }
 0x1ea   : > { %2313 = vmatpush.msra.mxu2 %v5306_v51  ;;  %2390 = vmatpush.msra.mxu3 %v2389_v13  ;;  %v2413_v62 = vand.u32 4294901760, %v2412_v46  ;;  %v2423_v13 = vand.u32 4294901760, %v5448_v41  ;;  %v2418_v55 = vsub.f32 %v5439_v3, %v2417_v15  ;;  %v2430_v19 = vsub.f32 %v5459_v28, %v2429_v58 }
 0x1eb   : > { %2278 = vmatpush.msra.mxu1 %v5190_v59 }
 0x1ec   : > { %2315 = vmatpush.msra.mxu2 %v5319_v38  ;;  %2396 = vmatpush.msra.mxu3 %v2395_v48  ;;  %v2424_v27 = vsub.f32 %v5448_v41, %v2423_v13  ;;  %v5472_v48 = vand.u32 4294901760, %v2292_v22  ;;  %v2419_v37 = vand.u32 4294901760, %v2418_v55  ;;  %v2431_v12 = vand.u32 4294901760, %v2430_v19 }
 0x1ed   : > { %2280 = vmatpush.msra.mxu1 %v5200_v35 }
 0x1ee   : > { %2317 = vmatpush.msra.mxu2 %v5332_v32  ;;  %2402 = vmatpush.msra.mxu3 %v2401_v42  ;;  %v2425_v59 = vand.u32 4294901760, %v2424_v27  ;;  %v5955_v42 = vand.u32 4294901760, %v5475_v57  ;;  %v5486_v30 = vsub.f32 %v2292_v22, %v5472_v48 }
 0x1ef   : > { %2282 = vmatpush.msra.mxu1 %v5211_v20 }
 0x1f0   : > { %2319 = vmatpush.msra.mxu2 %v5343_v23  ;;  %2408 = vmatpush.msra.mxu3 %v2407_v56  ;;  %v2436_v35 = vsub.f32 %v5475_v57, %v5955_v42  ;;  %v2441_v9 = vand.u32 4294901760, %v5486_v30 }
 0x1f1   : > { %2284 = vmatpush.msra.mxu1 %v5278_v4 }
 0x1f2   : > { %2321 = vmatpush.msra.mxu2 %v5354_v40  ;;  %2414 = vmatpush.msra.mxu3 %v2413_v62  ;;  %v2437_v61 = vand.u32 4294901760, %v2436_v35  ;;  %v2442_v56 = vsub.f32 %v5486_v30, %v2441_v9  ;;  %v1930_v35 = vld [vmem:[%s5939_s5] sm:$0xf] }
 0x1f4   : > { %2323 = vmatpush.msra.mxu2 %v5370_v8  ;;  %2420 = vmatpush.msra.mxu3 %v2419_v37  ;;  %v2443_v46 = vand.u32 4294901760, %v2442_v56 }
 0x1f6   : > { %2325 = vmatpush.msra.mxu2 %v5383_v6  ;;  %2426 = vmatpush.msra.mxu3 %v2425_v59 }
 0x1f8   : > { %2327 = vmatpush.msra.mxu2 %v5393_v44  ;;  %2432 = vmatpush.msra.mxu3 %v2431_v12 }
 0x1fa   : > { %2329 = vmatpush.msra.mxu2 %v5404_v0  ;;  %2438 = vmatpush.msra.mxu3 %v2437_v61 }
 0x1fc   : > { %2331 = vmatpush.msra.mxu2 %v5420_v1  ;;  %2444 = vmatpush.msra.mxu3 %v2443_v46 }
 0x1fe   : > { %2333 = vmatpush.msra.mxu2 %v5433_v52 }
 0x200   : > { %2335 = vmatpush.msra.mxu2 %v5445_v26 }
 0x202   : > { %2337 = vmatpush.msra.mxu2 %v5456_v14 }
 0x204   : > { %2339 = vmatpush.msra.mxu2 %v5472_v48 }
 0x23c   : > { %v1781_v55 = vpop.f32.mrf.mxu0 }
 0x23e   : > { %v1820_v27 = vpop.f32.mrf.mxu1 }
 0x240   : > { %v1727_v20 = vpop.f32.mrf.mxu3 }
 0x248   : > { %v1626_v43 = vpop.f32.mrf.mxu2  ;;  %v1926_v42 = vpop.f32.mrf.mxu3 }
 0x249   : > { %v1728_v62 = vadd.f32 %v1727_v20, %v1626_v43 }
 0x24b   : > { %v1782_v22 = vadd.f32 %v1781_v55, %v1728_v62  ;;  %v2964_v62 = vld [vmem:[#allocation10 + $0x130] sm:$0xff] }
 0x24d   : > { %v1821_v37 = vadd.f32 %v1820_v27, %v1782_v22 }
 0x250   : > { %v1889_v19 = vpop.f32.mrf.mxu2 }
 0x251   : > { %v1890_v59 = vadd.f32 %v1889_v19, %v1821_v37 }
 0x253   : > { %v1927_v4 = vadd.f32 %v1926_v42, %v1890_v59 }
 0x255   : > { %v1929_v12 = vadd.f32 %v1927_v4, %v5090_v54  ;;  %v2963_v4 = vld [vmem:[#allocation10 + $0x128] sm:$0xff] }
 0x257   : > { %v1931_v56 = vadd.f32 %v1930_v35, %v1929_v12 }
 0x259   : > { %v1932_v61 = vmax.f32 %v1931_v56, 0.0 }
 0x25b   : > { %v5502_v46 = vand.u32 4294901760, %v1932_v61 }
 0x25d   : > { %v5505_v20 = vsub.f32 %v1932_v61, %v5502_v46  ;;  %2087 = vmatmul.f32.vlgmr.msrb.gmra.mxu1 %v5502_v46 }
 0x25e   : > { %2505 = vmatpush.msrb.mxu1 %v5289_v50 }
 0x25f   : > { %2141 = vmatmul.f32.vlgmr.msrb.gmra.mxu2 %v5505_v20  ;;  %v5511_v42 = vand.u32 4294901760, %v5505_v20 }
 0x260   : > { %2507 = vmatpush.msrb.mxu1 %v5300_v24  ;;  %2546 = vmatpush.msrb.mxu2 %v2351_v39  ;;  %v2972_v39 = vld [vmem:[#allocation10 + $0x170] sm:$0xff] }
 0x261   : > { %2180 = vmatmul.f32.vlgmr.msrb.gmra.mxu3 %v5511_v42  ;;  %v1984_v54 = vsub.f32 %v5505_v20, %v5511_v42 }
 0x262   : > { %2509 = vmatpush.msrb.mxu1 %v5306_v51  ;;  %2550 = vmatpush.msrb.mxu2 %v2357_v63  ;;  %v2971_v63 = vld [vmem:[#allocation10 + $0x168] sm:$0xff] }
 0x263   : > { %2613 = vmatpush.msrb.mxu3 %v5289_v50  ;;  %v5523_v43 = vand.u32 4294901760, %v1984_v54  ;;  %v5995_v50 = vand.u32 4294901760, %v5475_v57  ;;  %v5676_v54 = vand.u32 4294901760, %v2964_v62 }
 0x264   : > { %2511 = vmatpush.msrb.mxu1 %v5319_v38  ;;  %2554 = vmatpush.msrb.mxu2 %v2363_v21 }
 0x265   : > { %2615 = vmatpush.msrb.mxu3 %v5300_v24  ;;  %1986 = vmatmul.f32.vlgmr.msrb.gmra.mxu0 %v5523_v43 }
 0x266   : > { %2286 = vmatmul.f32.vlgmr.msra.gmra.mxu1 %v5502_v46  ;;  %2452 = vmatpush.msrb.mxu0 %v5298_v5  ;;  %v2973_v5 = vld [vmem:[#allocation10 + $0x178] sm:$0xff] }
 0x267   : > { %2513 = vmatpush.msrb.mxu1 %v5332_v32  ;;  %2558 = vmatpush.msrb.mxu2 %v2369_v17  ;;  %v5606_v24 = vand.u32 4294901760, %v2973_v5  ;;  %v2290_v17 = vld [vmem:[#allocation8] sm:$0xf] }
 0x268   : > { %2617 = vmatpush.msrb.mxu3 %v5306_v51  ;;  %2345 = vmatmul.f32.vlgmr.msra.gmra.mxu2 %v5523_v43 }
 0x269   : > { %2455 = vmatpush.msrb.mxu0 %v5309_v7  ;;  %2515 = vmatpush.msrb.mxu1 %v5343_v23  ;;  %v5611_v21 = vsub.f32 %v2973_v5, %v5606_v24 }
 0x26a   : > { %2562 = vmatpush.msrb.mxu2 %v2375_v33  ;;  %2619 = vmatpush.msrb.mxu3 %v5319_v38 }
 0x26b   : > { %2446 = vmatmul.f32.vlgmr.msra.gmra.mxu3 %v5502_v46  ;;  %2458 = vmatpush.msrb.mxu0 %v5322_v60  ;;  %v5608_v60 = vand.u32 4294901760, %v2972_v39 }
 0x26c   : > { %2517 = vmatpush.msrb.mxu1 %v5354_v40  ;;  %2566 = vmatpush.msrb.mxu2 %v2381_v25  ;;  %v2968_v25 = vld [vmem:[#allocation10 + $0x150] sm:$0xff] }
 0x26d   : > { %2621 = vmatpush.msrb.mxu3 %v5332_v32  ;;  %2461 = vmatpush.msrb.mxu0 %v5335_v16  ;;  %v2970_v32 = vld [vmem:[#allocation10 + $0x160] sm:$0xff]  ;;  %v5613_v16 = vand.u32 4294901760, %v2971_v63 }
 0x26e   : > { %2519 = vmatpush.msrb.mxu1 %v5370_v8  ;;  %2570 = vmatpush.msrb.mxu2 %v2387_v53 }
 0x26f   : > { %2623 = vmatpush.msrb.mxu3 %v5343_v23  ;;  %2249 = vmatmul.f32.vlgmr.msra.gmra.mxu0 %v5502_v46  ;;  %v5623_v53 = vsub.f32 %v2971_v63, %v5613_v16 }
 0x270   : > { %2464 = vmatpush.msrb.mxu0 %v5346_v47  ;;  %2521 = vmatpush.msrb.mxu1 %v5383_v6  ;;  %v2969_v47 = vld [vmem:[#allocation10 + $0x158] sm:$0xff] }
 0x271   : > { %2574 = vmatpush.msrb.mxu2 %v2393_v31  ;;  %2625 = vmatpush.msrb.mxu3 %v5354_v40  ;;  %v5616_v40 = vsub.f32 %v2972_v39, %v5608_v60  ;;  %v2962_v39 = vld [vmem:[#allocation10 + $0x120] sm:$0xff] }
 0x272   : > { %2467 = vmatpush.msrb.mxu0 %v5357_v45  ;;  %2523 = vmatpush.msrb.mxu1 %v5393_v44  ;;  %v5618_v45 = vand.u32 4294901760, %v2970_v32 }
 0x273   : > { %2578 = vmatpush.msrb.mxu2 %v2399_v18  ;;  %2627 = vmatpush.msrb.mxu3 %v5370_v8  ;;  %v2806_v8 = vsel %vm2651_vm1, %v2290_v17, 0 }
 0x274   : > { %2470 = vmatpush.msrb.mxu0 %v5373_v36  ;;  %2525 = vmatpush.msrb.mxu1 %v5404_v0  ;;  %v3017_v36 = vand.u32 4294901760, %v5611_v21  ;;  %v5629_v31 = vand.u32 4294901760, %v2806_v8 }
 0x275   : > { %2582 = vmatpush.msrb.mxu2 %v2405_v2  ;;  %2629 = vmatpush.msrb.mxu3 %v5383_v6  ;;  %v5625_v6 = vand.u32 4294901760, %v2969_v47 }
 0x276   : > { %2473 = vmatpush.msrb.mxu0 %v5387_v49  ;;  %2527 = vmatpush.msrb.mxu1 %v5420_v1  ;;  %v2967_v49 = vld [vmem:[#allocation10 + $0x148] sm:$0xff] }
 0x277   : > { %2586 = vmatpush.msrb.mxu2 %v2411_v34  ;;  %2631 = vmatpush.msrb.mxu3 %v5393_v44  ;;  %v2966_v34 = vld [vmem:[#allocation10 + $0x140] sm:$0xff] }
 0x278   : > { %2476 = vmatpush.msrb.mxu0 %v5396_v10  ;;  %2529 = vmatpush.msrb.mxu1 %v5433_v52  ;;  %v5627_v10 = vand.u32 4294901760, %v2968_v25 }
 0x279   : > { %2590 = vmatpush.msrb.mxu2 %v2417_v15  ;;  %2633 = vmatpush.msrb.mxu3 %v5404_v0  ;;  %v3023_v0 = vand.u32 4294901760, %v5616_v40 }
 0x27a   : > { %2479 = vmatpush.msrb.mxu0 %v5407_v29  ;;  %2531 = vmatpush.msrb.mxu1 %v5445_v26  ;;  %v5633_v29 = vsub.f32 %v2970_v32, %v5618_v45  ;;  %v5645_v15 = vsub.f32 %v2968_v25, %v5627_v10  ;;  %v5702_v25 = vand.u32 4294901760, %v2962_v39 }
 0x27b   : > { %2594 = vmatpush.msrb.mxu2 %v2423_v13  ;;  %2635 = vmatpush.msrb.mxu3 %v5420_v1  ;;  %v3018_v1 = vsub.f32 %v5611_v21, %v3017_v36  ;;  %v2965_v13 = vld [vmem:[#allocation10 + $0x138] sm:$0xff] }
 0x27c   : > { %2482 = vmatpush.msrb.mxu0 %v5423_v11  ;;  %2533 = vmatpush.msrb.mxu1 %v5456_v14  ;;  %v5638_v11 = vand.u32 4294901760, %v2967_v49  ;;  %v5664_v37 = vand.u32 4294901760, %v2965_v13  ;;  %v5961_v59 = vand.u32 4294901760, %v5645_v15 }
 0x27d   : > { %2598 = vmatpush.msrb.mxu2 %v2429_v58  ;;  %2637 = vmatpush.msrb.mxu3 %v5433_v52  ;;  %v3024_v58 = vsub.f32 %v5616_v40, %v3023_v0 }
 0x27e   : > { %2485 = vmatpush.msrb.mxu0 %v5439_v3  ;;  %2535 = vmatpush.msrb.mxu1 %v5472_v48  ;;  %v3029_v3 = vand.u32 4294901760, %v5623_v53  ;;  %v5687_v63 = vsub.f32 %v2965_v13, %v5664_v37  ;;  %v3048_v32 = vsub.f32 %v5645_v15, %v5961_v59 }
 0x27f   : > { %2602 = vmatpush.msrb.mxu2 %v5995_v50  ;;  %2639 = vmatpush.msrb.mxu3 %v5445_v26  ;;  %v5642_v26 = vsub.f32 %v2969_v47, %v5625_v6  ;;  %v3025_v12 = vand.u32 4294901760, %v3024_v58  ;;  %v5722_v58 = vsub.f32 %v2962_v39, %v5702_v25  ;;  %v2958_v39 = vld [vmem:[#allocation10 + $0x100] sm:$0xff] }
 0x280   : > { %2539 = vmatmul.f32.vlgmr.msrb.gmra.mxu1 %v5511_v42  ;;  %2488 = vmatpush.msrb.mxu0 %v5448_v41  ;;  %v3030_v22 = vsub.f32 %v5623_v53, %v3029_v3 }
 0x281   : > { %2606 = vmatpush.msrb.mxu2 %v2441_v9  ;;  %2641 = vmatpush.msrb.mxu3 %v5456_v14  ;;  %v5648_v14 = vsub.f32 %v2806_v8, %v5629_v31  ;;  %v5657_v9 = vsub.f32 %v2967_v49, %v5638_v11  ;;  %v3041_v27 = vand.u32 4294901760, %v5642_v26  ;;  %v2650_v8 = vld [vmem:[#allocation8 + $0x4] sm:$0xf] }
 0x282   : > { %2608 = vmatmul.f32.vlgmr.msrb.gmra.mxu2 %v5502_v46  ;;  %2491 = vmatpush.msrb.mxu0 %v5459_v28 }
 0x283   : > { %2643 = vmatpush.msrb.mxu3 %v5472_v48  ;;  %v3035_v48 = vand.u32 4294901760, %v5633_v29  ;;  %v5965_v35 = vand.u32 4294901760, %v5648_v14  ;;  %v5959_v5 = vand.u32 4294901760, %v5657_v9 }
 0x284   : > { %2645 = vmatmul.f32.vlgmr.msrb.gmra.mxu3 %v5502_v46  ;;  %2494 = vmatpush.msrb.mxu0 %v5475_v57  ;;  %v5654_v57 = vand.u32 4294901760, %v2966_v34 }
 0x285   : > { %v3036_v56 = vsub.f32 %v5633_v29, %v3035_v48  ;;  %v3054_v49 = vsub.f32 %v5657_v9, %v5959_v5 }
 0x286   : > { %2497 = vmatpush.msrb.mxu0 %v5486_v30  ;;  %v3019_v30 = vand.u32 4294901760, %v3018_v1  ;;  %v5674_v61 = vsub.f32 %v2966_v34, %v5654_v57 }
 0x287   : > { %2500 = vmatmul.f32.vlgmr.msrb.gmra.mxu0 %v5505_v20  ;;  %v3037_v47 = vand.u32 4294901760, %v3036_v56 }
 0x288   : > { %v5958_v17 = vand.u32 4294901760, %v5674_v61 }
 0x28a   : > { %v3060_v13 = vsub.f32 %v5674_v61, %v5958_v17 }
 0x2da   : > { %v2088_v51 = vpop.f32.mrf.mxu1 }
 0x2e2   : > { %v1987_v7 = vpop.f32.mrf.mxu0  ;;  %v2142_v23 = vpop.f32.mrf.mxu2 }
 0x2e3   : > { %v2089_v38 = vadd.f32 %v2088_v51, %v1987_v7  ;;  %v2287_v41 = vpop.f32.mrf.mxu1  ;;  %v3031_v51 = vand.u32 4294901760, %v3030_v22  ;;  %v3042_v7 = vsub.f32 %v5642_v26, %v3041_v27 }
 0x2e4   : > { %v2181_v44 = vpop.f32.mrf.mxu3 }
 0x2e5   : > { %v2143_v33 = vadd.f32 %v2142_v23, %v2089_v38  ;;  %v5689_v38 = vand.u32 4294901760, %v2963_v4  ;;  %v2961_v23 = vld [vmem:[#allocation10 + $0x118] sm:$0xff] }
 0x2e6   : > { %v5713_v34 = vand.u32 4294901760, %v2961_v23 }
 0x2e7   : > { %v2182_v18 = vadd.f32 %v2181_v44, %v2143_v33  ;;  %v5700_v33 = vsub.f32 %v2964_v62, %v5676_v54  ;;  %v2960_v44 = vld [vmem:[#allocation10 + $0x110] sm:$0xff]  ;;  %v5711_v1 = vsub.f32 %v2963_v4, %v5689_v38  ;;  %v2959_v62 = vld [vmem:[#allocation10 + $0x108] sm:$0xff] }
 0x2e9   : > { %v5960_v4 = vand.u32 4294901760, %v5711_v1 }
 0x2ec   : > { %v2250_v2 = vpop.f32.mrf.mxu0 }
 0x2ed   : > { %v2251_v52 = vadd.f32 %v2250_v2, %v2182_v18  ;;  %v3043_v18 = vand.u32 4294901760, %v3042_v7  ;;  %v5956_v2 = vand.u32 4294901760, %v5687_v63  ;;  %v3061_v7 = vand.u32 4294901760, %v3060_v13 }
 0x2ef   : > { %v2288_v28 = vadd.f32 %v2287_v41, %v2251_v52  ;;  %v3049_v52 = vand.u32 4294901760, %v3048_v32  ;;  %v2653_v41 = vsel %vm2651_vm1, %v2650_v8, 0  ;;  %v3066_v22 = vsub.f32 %v5687_v63, %v5956_v2 }
 0x2f0   : > { %v5734_v56 = vand.u32 4294901760, %v2653_v41 }
 0x2f1   : > { %v2809_v55 = vsel %vm2655_vm2, %v2288_v28, 0  ;;  %v5957_v28 = vand.u32 4294901760, %v5700_v33  ;;  %v3067_v2 = vand.u32 4294901760, %v3066_v22 }
 0x2f2   : > { %v5666_v19 = vand.u32 4294901760, %v2809_v55 }
 0x2f3   : > { %v3072_v32 = vsub.f32 %v5700_v33, %v5957_v28  ;;  %v5754_v28 = vsub.f32 %v2653_v41, %v5734_v56 }
 0x2f4   : > { %v5679_v50 = vsub.f32 %v2809_v55, %v5666_v19  ;;  %2903 = vmatpush.msra.mxu3 %v5666_v19  ;;  %v3055_v55 = vand.u32 4294901760, %v3054_v49  ;;  %v2447_v49 = vpop.f32.mrf.mxu3 }
 0x2f5   : > { %2907 = vmatmul.f32.vlgmr.msra.gmra.mxu3 %v5965_v35  ;;  %v3073_v5 = vand.u32 4294901760, %v3072_v32  ;;  %v2678_v32 = vand.u32 4294901760, %v5754_v28 }
 0x2f6   : > { %3020 = vmatpush.msrb.mxu3 %v3019_v30  ;;  %2880 = vmatpush.msra.mxu2 %v5679_v50  ;;  %v5724_v30 = vand.u32 4294901760, %v2960_v44 }
 0x2f7   : > { %2883 = vmatmul.f32.vlgmr.msra.gmra.mxu2 %v5648_v14 }
 0x2f8   : > { %2975 = vmatpush.msrb.mxu2 %v5606_v24  ;;  %3026 = vmatpush.msrb.mxu3 %v3025_v12  ;;  %v5732_v12 = vsub.f32 %v2961_v23, %v5713_v34  ;;  %v5744_v8 = vsub.f32 %v2960_v44, %v5724_v30  ;;  %v2346_v23 = vpop.f32.mrf.mxu2 }
 0x2f9   : > { %v2448_v17 = vadd.f32 %v2447_v49, %v2346_v23 }
 0x2fa   : > { %2977 = vmatpush.msrb.mxu2 %v5608_v60  ;;  %3032 = vmatpush.msrb.mxu3 %v3031_v51  ;;  %v5736_v51 = vand.u32 4294901760, %v2959_v62  ;;  %v5963_v13 = vand.u32 4294901760, %v5732_v12  ;;  %v5964_v22 = vand.u32 4294901760, %v5744_v8 }
 0x2fc   : > { %2979 = vmatpush.msrb.mxu2 %v5613_v16  ;;  %3038 = vmatpush.msrb.mxu3 %v3037_v47  ;;  %v5962_v47 = vand.u32 4294901760, %v5722_v58  ;;  %v5757_v44 = vsub.f32 %v2959_v62, %v5736_v51 }
 0x2fd   : > { %v2540_v23 = vpop.f32.mrf.mxu1 }
 0x2fe   : > { %2981 = vmatpush.msrb.mxu2 %v5618_v45  ;;  %3044 = vmatpush.msrb.mxu3 %v3043_v18  ;;  %v5746_v18 = vand.u32 4294901760, %v2958_v39  ;;  %v3101_v49 = vand.u32 4294901760, %v5757_v44 }
 0x300   : > { %2983 = vmatpush.msrb.mxu2 %v5625_v6  ;;  %3050 = vmatpush.msrb.mxu3 %v3049_v52  ;;  %v3078_v52 = vsub.f32 %v5711_v1, %v5960_v4  ;;  %v5765_v59 = vsub.f32 %v2958_v39, %v5746_v18 }
 0x302   : > { %2985 = vmatpush.msrb.mxu2 %v5627_v10  ;;  %3056 = vmatpush.msrb.mxu3 %v3055_v55  ;;  %v3084_v55 = vsub.f32 %v5722_v58, %v5962_v47  ;;  %v3079_v62 = vand.u32 4294901760, %v3078_v52 }
 0x304   : > { %2987 = vmatpush.msrb.mxu2 %v5638_v11  ;;  %3062 = vmatpush.msrb.mxu3 %v3061_v7  ;;  %v2501_v4 = vpop.f32.mrf.mxu0  ;;  %v3090_v7 = vsub.f32 %v5732_v12, %v5963_v13  ;;  %v3085_v39 = vand.u32 4294901760, %v3084_v55 }
 0x305   : > { %v2502_v41 = vadd.f32 %v2501_v4, %v2448_v17  ;;  %v3096_v17 = vsub.f32 %v5744_v8, %v5964_v22  ;;  %v3107_v4 = vand.u32 4294901760, %v5765_v59 }
 0x306   : > { %2989 = vmatpush.msrb.mxu2 %v5654_v57  ;;  %3068 = vmatpush.msrb.mxu3 %v3067_v2  ;;  %v2609_v2 = vpop.f32.mrf.mxu2  ;;  %v3091_v13 = vand.u32 4294901760, %v3090_v7 }
 0x307   : > { %v2541_v47 = vadd.f32 %v2540_v23, %v2502_v41  ;;  %v2679_v41 = vsub.f32 %v5754_v28, %v2678_v32  ;;  %v2646_v23 = vpop.f32.mrf.mxu3  ;;  %v3097_v22 = vand.u32 4294901760, %v3096_v17  ;;  %v6002_v17 = vand.u32 4294901760, %v5711_v1 }
 0x308   : > { %2991 = vmatpush.msrb.mxu2 %v5664_v37  ;;  %3074 = vmatpush.msrb.mxu3 %v3073_v5  ;;  %v3102_v5 = vsub.f32 %v5757_v44, %v3101_v49 }
 0x309   : > { %v2610_v52 = vadd.f32 %v2609_v2, %v2541_v47  ;;  %v3108_v47 = vsub.f32 %v5765_v59, %v3107_v4  ;;  %v2680_v7 = vand.u32 4294901760, %v2679_v41 }
 0x30a   : > { %2993 = vmatpush.msrb.mxu2 %v5676_v54  ;;  %3080 = vmatpush.msrb.mxu3 %v3079_v62  ;;  %v3103_v35 = vand.u32 4294901760, %v3102_v5 }
 0x30b   : > { %v2647_v55 = vadd.f32 %v2646_v23, %v2610_v52  ;;  %v3109_v23 = vand.u32 4294901760, %v3108_v47 }
 0x30c   : > { %2995 = vmatpush.msrb.mxu2 %v5689_v38  ;;  %3086 = vmatpush.msrb.mxu3 %v3085_v39 }
 0x30d   : > { %v2657_v62 = vsel %vm2655_vm2, %v2647_v55, 0 }
 0x30e   : > { %2997 = vmatpush.msrb.mxu2 %v5702_v25  ;;  %3092 = vmatpush.msrb.mxu3 %v3091_v13  ;;  %v2674_v2 = vand.u32 4294901760, %v2657_v62 }
 0x310   : > { %2999 = vmatpush.msrb.mxu2 %v5713_v34  ;;  %3098 = vmatpush.msrb.mxu3 %v3097_v22  ;;  %v2701_v52 = vsub.f32 %v2657_v62, %v2674_v2 }
 0x311   : > { %2675 = vmatpush.msra.mxu0 %v2674_v2 }
 0x312   : > { %2681 = vmatmul.f32.vlgmr.msra.gmra.mxu0 %v2680_v7  ;;  %3001 = vmatpush.msrb.mxu2 %v5724_v30  ;;  %v2702_v39 = vand.u32 4294901760, %v2701_v52 }
 0x313   : > { %2728 = vmatpush.msrb.mxu0 %v2701_v52  ;;  %3104 = vmatpush.msrb.mxu3 %v3103_v35  ;;  %v2854_v35 = vand.u32 4294901760, %v5679_v50 }
 0x314   : > { %3003 = vmatpush.msrb.mxu2 %v5736_v51  ;;  %v2703_v13 = vsub.f32 %v2701_v52, %v2702_v39 }
 0x315   : > { %2777 = vmatpush.msra.mxu0 %v2702_v39  ;;  %3110 = vmatpush.msrb.mxu3 %v3109_v23 }
 0x316   : > { %3112 = vmatmul.f32.vlgmr.msrb.gmra.mxu3 %v5502_v46  ;;  %3005 = vmatpush.msrb.mxu2 %v5746_v18  ;;  %v2704_v22 = vand.u32 4294901760, %v2703_v13 }
 0x317   : > { %3279 = vmatpush.msra.mxu3 %v5606_v24  ;;  %3011 = vmatmul.f32.vlgmr.msrb.gmra.mxu2 %v5523_v43  ;;  %v2855_v43 = vsub.f32 %v5679_v50, %v2854_v35 }
 0x318   : > { %3212 = vmatpush.msra.mxu2 %v3017_v36  ;;  %2705 = vmatpush.msra.mxu1 %v2704_v22 }
 0x319   : > { %3281 = vmatpush.msra.mxu3 %v5608_v60  ;;  %2707 = vmatmul.f32.vlgmr.msra.gmra.mxu1 %v5734_v56  ;;  %v2856_v36 = vand.u32 4294901760, %v2855_v43 }
 0x31a   : > { %2731 = vmatmul.f32.vlgmr.msrb.gmra.mxu0 %v5754_v28  ;;  %2751 = vmatpush.msrb.mxu1 %v2674_v2  ;;  %v5999_v28 = vand.u32 4294901760, %v5674_v61 }
 0x31b   : > { %2827 = vmatpush.msrb.mxu0 %v5666_v19  ;;  %3216 = vmatpush.msra.mxu2 %v3023_v0  ;;  %v5996_v0 = vand.u32 4294901760, %v5648_v14 }
 0x31c   : > { %3283 = vmatpush.msra.mxu3 %v5613_v16  ;;  %2799 = vmatpush.msra.mxu1 %v2674_v2 }
 0x31d   : > { %3220 = vmatpush.msra.mxu2 %v3029_v3  ;;  %v2831_v3 = vsub.f32 %v5648_v14, %v5996_v0  ;;  %v6001_v14 = vand.u32 4294901760, %v5700_v33 }
 0x31e   : > { %3285 = vmatpush.msra.mxu3 %v5618_v45 }
 0x31f   : > { %3224 = vmatpush.msra.mxu2 %v3035_v48  ;;  %v5997_v48 = vand.u32 4294901760, %v5645_v15  ;;  %v2832_v50 = vand.u32 4294901760, %v2831_v3 }
 0x320   : > { %3287 = vmatpush.msra.mxu3 %v5625_v6 }
 0x321   : > { %3228 = vmatpush.msra.mxu2 %v3041_v27  ;;  %2755 = vmatmul.f32.vlgmr.msrb.gmra.mxu1 %v2678_v32  ;;  %v5998_v27 = vand.u32 4294901760, %v5657_v9  ;;  %v6000_v32 = vand.u32 4294901760, %v5687_v63 }
 0x322   : > { %3289 = vmatpush.msra.mxu3 %v5627_v10  ;;  %2779 = vmatmul.f32.vlgmr.msra.gmra.mxu0 %v5734_v56 }
 0x323   : > { %2857 = vmatpush.msrb.mxu1 %v2856_v36  ;;  %2929 = vmatpush.msra.mxu0 %v2854_v35 }
 0x324   : > { %3232 = vmatpush.msra.mxu2 %v5997_v48  ;;  %3291 = vmatpush.msra.mxu3 %v5638_v11 }
 0x326   : > { %3236 = vmatpush.msra.mxu2 %v5998_v27  ;;  %3293 = vmatpush.msra.mxu3 %v5654_v57 }
 0x328   : > { %3240 = vmatpush.msra.mxu2 %v5999_v28  ;;  %3295 = vmatpush.msra.mxu3 %v5664_v37 }
 0x329   : > { %2801 = vmatmul.f32.vlgmr.msra.gmra.mxu1 %v5734_v56  ;;  %v6003_v56 = vand.u32 4294901760, %v5722_v58 }
 0x32a   : > { %3244 = vmatpush.msra.mxu2 %v6000_v32  ;;  %3297 = vmatpush.msra.mxu3 %v5676_v54  ;;  %v3470_v32 = vld [vmem:[#allocation11] sm:$0xf] }
 0x32b   : > { %2833 = vmatmul.f32.vlgmr.msrb.gmra.mxu0 %v2832_v50  ;;  %2951 = vmatpush.msra.mxu1 %v5666_v19 }
 0x32c   : > { %3118 = vmatpush.msrb.mxu0 %v5611_v21  ;;  %3248 = vmatpush.msra.mxu2 %v6001_v14  ;;  %v6004_v21 = vand.u32 4294901760, %v5732_v12 }
 0x32d   : > { %3299 = vmatpush.msra.mxu3 %v5689_v38 }
 0x32e   : > { %3121 = vmatpush.msrb.mxu0 %v5616_v40  ;;  %3252 = vmatpush.msra.mxu2 %v6002_v17  ;;  %v6005_v40 = vand.u32 4294901760, %v5744_v8 }
 0x32f   : > { %3301 = vmatpush.msra.mxu3 %v5702_v25 }
 0x330   : > { %3124 = vmatpush.msrb.mxu0 %v5623_v53  ;;  %3256 = vmatpush.msra.mxu2 %v6003_v56  ;;  %v3774_v56 = vld [vmem:[%s4239_s21] sm:$0xff] }
 0x331   : > { %3303 = vmatpush.msra.mxu3 %v5713_v34  ;;  %2859 = vmatmul.f32.vlgmr.msrb.gmra.mxu1 %v5629_v31 }
 0x332   : > { %3127 = vmatpush.msrb.mxu0 %v5633_v29  ;;  %3260 = vmatpush.msra.mxu2 %v6004_v21 }
 0x333   : > { %3305 = vmatpush.msra.mxu3 %v5724_v30  ;;  %3171 = vmatpush.msrb.mxu1 %v5606_v24 }
 0x334   : > { %3130 = vmatpush.msrb.mxu0 %v5642_v26  ;;  %3264 = vmatpush.msra.mxu2 %v6005_v40 }
 0x335   : > { %3307 = vmatpush.msra.mxu3 %v5736_v51  ;;  %3173 = vmatpush.msrb.mxu1 %v5608_v60 }
 0x336   : > { %3133 = vmatpush.msrb.mxu0 %v5645_v15  ;;  %3268 = vmatpush.msra.mxu2 %v3101_v49 }
 0x337   : > { %3309 = vmatpush.msra.mxu3 %v5746_v18  ;;  %3175 = vmatpush.msrb.mxu1 %v5613_v16 }
 0x338   : > { %3136 = vmatpush.msrb.mxu0 %v5657_v9  ;;  %3311 = vmatmul.f32.vlgmr.msra.gmra.mxu3 %v5502_v46 }
 0x339   : > { %3272 = vmatpush.msra.mxu2 %v3107_v4  ;;  %2931 = vmatmul.f32.vlgmr.msra.gmra.mxu0 %v5629_v31 }
 0x33a   : > { %3274 = vmatmul.f32.vlgmr.msra.gmra.mxu2 %v5502_v46  ;;  %3139 = vmatpush.msrb.mxu0 %v5674_v61 }
 0x33b   : > { %3177 = vmatpush.msrb.mxu1 %v5618_v45 }
 0x33c   : > { %2953 = vmatmul.f32.vlgmr.msra.gmra.mxu1 %v5629_v31  ;;  %3142 = vmatpush.msrb.mxu0 %v5687_v63 }
 0x33d   : > { %3179 = vmatpush.msrb.mxu1 %v5625_v6 }
 0x33e   : > { %3145 = vmatpush.msrb.mxu0 %v5700_v33 }
 0x33f   : > { %3181 = vmatpush.msrb.mxu1 %v5627_v10 }
 0x340   : > { %3148 = vmatpush.msrb.mxu0 %v5711_v1 }
 0x341   : > { %3183 = vmatpush.msrb.mxu1 %v5638_v11 }
 0x342   : > { %3151 = vmatpush.msrb.mxu0 %v5722_v58 }
 0x343   : > { %3185 = vmatpush.msrb.mxu1 %v5654_v57 }
 0x344   : > { %3154 = vmatpush.msrb.mxu0 %v5732_v12 }
 0x345   : > { %3187 = vmatpush.msrb.mxu1 %v5664_v37 }
 0x346   : > { %3157 = vmatpush.msrb.mxu0 %v5744_v8 }
 0x347   : > { %3189 = vmatpush.msrb.mxu1 %v5676_v54 }
 0x348   : > { %3160 = vmatpush.msrb.mxu0 %v5757_v44 }
 0x349   : > { %3191 = vmatpush.msrb.mxu1 %v5689_v38  ;;  %v3316_v38 = vld [vmem:[#allocation8 + $0x8] sm:$0xf] }
 0x34a   : > { %3163 = vmatpush.msrb.mxu0 %v5765_v59  ;;  %v3318_v33 = vsel %vm2651_vm1, %v3316_v38, 0 }
 0x34b   : > { %3193 = vmatpush.msrb.mxu1 %v5702_v25  ;;  %3166 = vmatmul.f32.vlgmr.msrb.gmra.mxu0 %v5505_v20  ;;  %v3340_v25 = vand.u32 4294901760, %v3318_v33 }
 0x34d   : > { %3195 = vmatpush.msrb.mxu1 %v5713_v34  ;;  %v3341_v34 = vsub.f32 %v3318_v33, %v3340_v25 }
 0x34f   : > { %3197 = vmatpush.msrb.mxu1 %v5724_v30  ;;  %v3342_v8 = vand.u32 4294901760, %v3341_v34 }
 0x351   : > { %3199 = vmatpush.msrb.mxu1 %v5736_v51  ;;  %v3343_v41 = vsub.f32 %v3341_v34, %v3342_v8 }
 0x353   : > { %3201 = vmatpush.msrb.mxu1 %v5746_v18  ;;  %v3344_v62 = vand.u32 4294901760, %v3343_v41 }
 0x354   : > { %3205 = vmatmul.f32.vlgmr.msrb.gmra.mxu1 %v5511_v42 }
 0x378   : > { %v2908_v19 = vpop.f32.mrf.mxu3 }
 0x37a   : > { %v2884_v9 = vpop.f32.mrf.mxu2 }
 0x38f   : > { %v2682_v46 = vpop.f32.mrf.mxu0 }
 0x396   : > { %v2708_v24 = vpop.f32.mrf.mxu1 }
 0x397   : > { %v2732_v60 = vpop.f32.mrf.mxu0  ;;  %v2709_v16 = vadd.f32 %v2708_v24, %v2682_v46 }
 0x399   : > { %v2733_v45 = vadd.f32 %v2732_v60, %v2709_v16  ;;  %v3113_v58 = vpop.f32.mrf.mxu3 }
 0x39a   : > { %v3012_v1 = vpop.f32.mrf.mxu2 }
 0x39b   : > { %v3114_v12 = vadd.f32 %v3113_v58, %v3012_v1 }
 0x39e   : > { %v2756_v53 = vpop.f32.mrf.mxu1 }
 0x39f   : > { %v2780_v6 = vpop.f32.mrf.mxu0  ;;  %v2757_v10 = vadd.f32 %v2756_v53, %v2733_v45 }
 0x3a1   : > { %v2781_v31 = vadd.f32 %v2780_v6, %v2757_v10 }
 0x3a6   : > { %v2802_v20 = vpop.f32.mrf.mxu1 }
 0x3a7   : > { %v2803_v11 = vadd.f32 %v2802_v20, %v2781_v31 }
 0x3a8   : > { %v2834_v29 = vpop.f32.mrf.mxu0 }
 0x3a9   : > { %v2835_v26 = vadd.f32 %v2834_v29, %v2803_v11 }
 0x3ae   : > { %v2860_v15 = vpop.f32.mrf.mxu1 }
 0x3af   : > { %v2861_v57 = vadd.f32 %v2860_v15, %v2835_v26 }
 0x3b1   : > { %v2885_v37 = vadd.f32 %v2884_v9, %v2861_v57 }
 0x3b3   : > { %v2909_v59 = vadd.f32 %v2908_v19, %v2885_v37 }
 0x3b6   : > { %v2932_v42 = vpop.f32.mrf.mxu0 }
 0x3b7   : > { %v2933_v61 = vadd.f32 %v2932_v42, %v2909_v59 }
 0x3b9   : > { %v2954_v54 = vpop.f32.mrf.mxu1 }
 0x3ba   : > { %v2955_v63 = vadd.f32 %v2954_v54, %v2933_v61 }
 0x3bb   : > { %v3312_v5 = vpop.f32.mrf.mxu3 }
 0x3bd   : > { %v3275_v49 = vpop.f32.mrf.mxu2 }
 0x3c8   : > { %v3167_v30 = vpop.f32.mrf.mxu0 }
 0x3c9   : > { %v3168_v51 = vadd.f32 %v3167_v30, %v3114_v12 }
 0x3d1   : > { %v3206_v18 = vpop.f32.mrf.mxu1 }
 0x3d2   : > { %v3207_v44 = vadd.f32 %v3206_v18, %v3168_v51 }
 0x3d4   : > { %v3276_v4 = vadd.f32 %v3275_v49, %v3207_v44 }
 0x3d6   : > { %v3313_v55 = vadd.f32 %v3312_v5, %v3276_v4 }
 0x3d8   : > { %v3321_v47 = vsel %vm2655_vm2, %v3313_v55, 0 }
 0x3d9   : > { %v3338_v7 = vand.u32 4294901760, %v3321_v47 }
 0x3db   : > { %3339 = vmatpush.msra.mxu0 %v3338_v7  ;;  %v3365_v2 = vsub.f32 %v3321_v47, %v3338_v7 }
 0x3dc   : > { %3345 = vmatmul.f32.vlgmr.msra.gmra.mxu0 %v3344_v62 }
 0x3dd   : > { %3392 = vmatpush.msrb.mxu0 %v3365_v2  ;;  %v3366_v52 = vand.u32 4294901760, %v3365_v2 }
 0x3df   : > { %3441 = vmatpush.msra.mxu0 %v3366_v52  ;;  %v3367_v23 = vsub.f32 %v3365_v2, %v3366_v52 }
 0x3e1   : > { %v3368_v39 = vand.u32 4294901760, %v3367_v23 }
 0x3e3   : > { %3369 = vmatpush.msra.mxu1 %v3368_v39 }
 0x3e4   : > { %3371 = vmatmul.f32.vlgmr.msra.gmra.mxu1 %v3340_v25  ;;  %3395 = vmatmul.f32.vlgmr.msrb.gmra.mxu0 %v3341_v34 }
 0x3e5   : > { %3415 = vmatpush.msrb.mxu1 %v3338_v7 }
 0x3e7   : > { %3463 = vmatpush.msra.mxu1 %v3338_v7 }
 0x3ec   : > { %3419 = vmatmul.f32.vlgmr.msrb.gmra.mxu1 %v3342_v8  ;;  %3443 = vmatmul.f32.vlgmr.msra.gmra.mxu0 %v3340_v25 }
 0x3f4   : > { %3465 = vmatmul.f32.vlgmr.msra.gmra.mxu1 %v3340_v25 }
 0x459   : > { %v3346_v13 = vpop.f32.mrf.mxu0 }
 0x461   : > { %v3372_v22 = vpop.f32.mrf.mxu1  ;;  %v3396_v35 = vpop.f32.mrf.mxu0 }
 0x462   : > { %v3373_v43 = vadd.f32 %v3372_v22, %v3346_v13 }
 0x464   : > { %v3397_v0 = vadd.f32 %v3396_v35, %v3373_v43 }
 0x469   : > { %v3420_v36 = vpop.f32.mrf.mxu1  ;;  %v3444_v48 = vpop.f32.mrf.mxu0 }
 0x46a   : > { %v3421_v3 = vadd.f32 %v3420_v36, %v3397_v0 }
 0x46c   : > { %v3445_v27 = vadd.f32 %v3444_v48, %v3421_v3 }
 0x471   : > { %v3466_v50 = vpop.f32.mrf.mxu1 }
 0x472   : > { %v3467_v28 = vadd.f32 %v3466_v50, %v3445_v27 }
 0x474   : > { %v3469_v14 = vadd.f32 %v3467_v28, %v2955_v63 }
 0x476   : > { %v3471_v17 = vadd.f32 %v3470_v32, %v3469_v14 }
 0x478   : > { %v3472_v21 = vadd.f32 %v3774_v56, %v3471_v17 }
 0x47a   : > { %v3473_v40 = vmax.f32 %v3472_v21, 0.0 }
 0x47c   : > { %3474 = vst [vmem:[%s401_s11] sm:$0xf] %v3473_v40 }
 0x47d   : > { %3982 = shalt.err (!%p3979_p8)
}
 0x47e   : > { %3698 = dma.vmem_to_hbm [thread:$0]  (%p4179_p4), %s3489_s20, 64, %s3491_s12, %s3476_s2  }
 0x47f PF: > { %s3502_s13 = sand.u32 1, %s4025_s24   ;;  %p6006_p10 = scmp.ge.s32.totalorder %s4037_s27, 2 }
 0x480   : > { %s3503_s21 = scalar_lea.sflag [#allocation4], %s3502_s13 }
 0x481   : > { %p3721_p13 = pnand %p6006_p10, %p4183_p6 }
 0x483   : > { %p3722_p11 = pneg %p3721_p13 }
 0x485   : > { %4020 = dma.done.wait (%p3722_p11), %s3503_s21, 64  }
 0x486   : > { %4022 = vsyncadd (%p3722_p11), %s3503_s21, 4294967232  ;;  %s6007_s16 = sld [smem:[#allocation20_spill]]  ;;  %p25_p0 = scmp.ge.s32.totalorder %s4151_s17, 4  }
 0x487   : > { %s6008_s26 = sld [smem:[#allocation21_spill]]  ;;  %s6009_s24 = smov %s4029_s25 }
 0x488   : > { %s6011_s27 = smov %s4151_s17  ;;  %27 = sbr.rel (!%p25_p0) target bundleno = 14 (0xe), region = 130 }
 0x48c   : > { %s6010_s25 = smov %s6007_s16 }
 0x48d   :  { %3509 = vsyncpa [#allocation3], 1 }
 0x48e   :  { %3511 = vsyncpa [#allocation3 + $0x1], 1 }
 0x48f   :  { %3512 = vsyncpa [#allocation6], 1 }
 0x490   :  { %3514 = vsyncpa [#allocation6 + $0x1], 1 }
 0x491   :  { %3515 = vsyncpa [#allocation9], 1 }
 0x492   :  { %3516 = vsyncpa [#allocation12], 1 }
 0x493   :  { %3517 = vsyncpa [#allocation4], 1 }
 0x494   :  { %3519 = vsyncpa [#allocation4 + $0x1], 1 }

</bundles_post_ra>
